<compile_context>
chip_gen: v7x
topology: tpu7x:2x2x1
jax: 0.10.0
libtpu: 0.0.40
codegen_flags: <defaults>
</compile_context>

<pallas_src>
import numpy as np
import jax
import jax.numpy as jnp
from jax import lax
from jax.experimental import pallas as pl
from jax.experimental.pallas import tpu as pltpu

# ---------------- model hyper-parameters (LiquidBlock defaults) -------------
UNITS = 20
OUT_FEATURES = 10
IN_FEATURES = 5

# AutoNCP(20, 10): inter+command = 10, command = max(int(0.4*10),1) = 4,
# inter = 6, motor = 10.  WiredCfCCell layers run inter -> command -> motor.
LAYER_SIZES = (6, 4, 10)
LAYER_IN_SIZES = (IN_FEATURES, 6, 4)
NUM_LAYERS = 3

P = 16                 # padded per-layer feature / state width (lane axis)
NUM_HEADS = 3          # ff1 | ff2 | merged-time (0.5*(Wa+Wb))
W_COLS = 128           # lane-dense slab width (heads packed at 16-lane stride)
W_ROWS = 2 * P         # [input part rows 0:P | recurrent part rows P:2P]
SUBLANE = 8            # f32 sublane tile


# ------------------------------ Pallas kernel -------------------------------
def _cfc_kernel(x_ref, h0_ref, w_ref, b_ref, h_ref, z0_ref):
    """x_ref : (T*Bp, P)   time-major, batch-padded, lane-padded input
       h0_ref: (L, Bp, P)  initial per-layer states (padded lanes zero)
       w_ref : (L, 2P, 128) fused lane-dense weights
       b_ref : (L, 1, 128)  fused biases
       h_ref : (L, Bp, P)   output: final per-layer states
       z0_ref: (T*Bp, 128)  scratch: hoisted layer-0 input projection"""
    Bp = h0_ref.shape[1]
    T = x_ref.shape[0] // Bp

    # ---- loop-invariant weight / bias loads (hoisted out of the recurrence)
    w0 = w_ref[0]
    wx0 = w0[:P, :]                     # layer-0 input part (P, 128)
    wh0 = w0[P:, :]                     # layer-0 recurrent part (P, 128)
    w1 = w_ref[1]                       # layer-1 fused (2P, 128)
    w2 = w_ref[2]                       # layer-2 fused (2P, 128)
    b0 = b_ref[0]                       # (1, 128)
    b1 = jnp.broadcast_to(b_ref[1], (Bp, W_COLS))   # hoisted broadcasts
    b2 = jnp.broadcast_to(b_ref[2], (Bp, W_COLS))

    # ---- hoisted layer-0 input projection for ALL timesteps: one MXU pass.
    z0_ref[...] = (
        jnp.dot(x_ref[...], wx0, preferred_element_type=jnp.float32) + b0)

    def gate(z):
        # One EUP push (full 128-lane tanh) covers all three heads:
        #   ff1 = tanh(z[:, 0:P]); ff2 = tanh(z[:, P:2P]);
        #   sigmoid(t_a + t_b) = 0.5 + 0.5*tanh((t_a+t_b)/2) and the merged
        #   time head was pre-scaled by 0.5 at pack time.
        zt = jnp.tanh(z)
        ff1 = zt[:, 0 * P:1 * P]
        ff2 = zt[:, 1 * P:2 * P]
        sig = 0.5 * zt[:, 2 * P:3 * P] + 0.5
        # ff1*(1-sig) + sig*ff2 == ff1 + sig*(ff2 - ff1)
        return ff1 + sig * (ff2 - ff1)

    def step(t, hs):
        h0_l, h1_l, h2_l = hs
        # ---- layer 0 (inter): input part precomputed, only recurrent dot.
        r = pl.multiple_of(t * Bp, SUBLANE)
        z = (z0_ref[pl.ds(r, Bp), :]
             + jnp.dot(h0_l, wh0, preferred_element_type=jnp.float32))
        h0_n = gate(z)
        # ---- layer 1 (command): single fused concat dot.
        z = jnp.dot(jnp.concatenate([h0_n, h1_l], axis=1), w1,
                    preferred_element_type=jnp.float32) + b1
        h1_n = gate(z)
        # ---- layer 2 (motor): single fused concat dot.
        z = jnp.dot(jnp.concatenate([h1_n, h2_l], axis=1), w2,
                    preferred_element_type=jnp.float32) + b2
        h2_n = gate(z)
        return (h0_n, h1_n, h2_n)

    hs = lax.fori_loop(0, T, step,
                       (h0_ref[0], h0_ref[1], h0_ref[2]), unroll=True)

    # Single writeback after the whole recurrence.
    h_ref[0] = hs[0]
    h_ref[1] = hs[1]
    h_ref[2] = hs[2]


# --------------------------- parameter construction -------------------------
def _xavier(key, shape):
    fan_out, fan_in = shape                  # torch Linear weight: (out, in)
    a = float(np.sqrt(6.0 / (fan_in + fan_out)))
    return jax.random.uniform(key, shape, jnp.float32, -a, a)


def init_params(key):
    """Deterministic parameters for the 3 WiredCfCCell layers."""
    # TODO(synk): exact AutoNCP(seed=22222) random adjacency is not reproduced;
    # a deterministic stand-in sparsity mask with the same layered structure
    # (all-ones recurrent block, >=1 fan-in per neuron) is used instead.
    params = []
    for l, (h, cin) in enumerate(zip(LAYER_SIZES, LAYER_IN_SIZES)):
        cat = cin + h
        keys = jax.random.split(jax.random.fold_in(key, l), 10)

        m_in = (jax.random.uniform(keys[8], (h, cin)) < 0.75).astype(jnp.float32)
        m_in = jnp.maximum(m_in, jax.nn.one_hot(jnp.arange(h) % cin, cin))
        mask = jnp.concatenate([m_in, jnp.ones((h, h), jnp.float32)], axis=1)

        def lin(kw, kb):
            w = _xavier(kw, (h, cat))
            bound = 1.0 / float(np.sqrt(cat))
            b = jax.random.uniform(kb, (h,), jnp.float32, -bound, bound)
            return w, b

        w1, b1 = lin(keys[0], keys[1]); w1 = w1 * mask
        w2, b2 = lin(keys[2], keys[3]); w2 = w2 * mask
        wa, ba = lin(keys[4], keys[5])
        wb, bb = lin(keys[6], keys[7])
        params.append(dict(w1=w1, b1=b1, w2=w2, b2=b2,
                           wa=wa, ba=ba, wb=wb, bb=bb, cin=cin, h=h))
    return params


def pack_params(params):
    """Pack all per-layer weights/biases into two stacked, lane-dense slabs.

    Weight slab  w: (L, 2P, 128)
      rows [0:cin]   cols [k*P : k*P+h] = W_k[:, :cin].T   (input part)
      rows [P:P+h]   cols [k*P : k*P+h] = W_k[:, cin:].T   (recurrent part)
    Bias slab    b: (L, 1, 128), cols [k*P : k*P+h] = b_k
    Head order k: 0 = ff1, 1 = ff2, 2 = merged time head 0.5*(Wa+Wb) (so that
    sigmoid(t_a + t_b) = 0.5 + 0.5*tanh of the packed head, ts == 1.0).
    All padding is zero, so padded lanes of the state stay exactly zero
    through the recurrence without any explicit masking.
    """
    w = np.zeros((NUM_LAYERS, W_ROWS, W_COLS), np.float32)
    b = np.zeros((NUM_LAYERS, 1, W_COLS), np.float32)
    for l, p in enumerate(params):
        cin, h = p["cin"], p["h"]
        heads = (
            (np.asarray(p["w1"]), np.asarray(p["b1"])),
            (np.asarray(p["w2"]), np.asarray(p["b2"])),
            (0.5 * (np.asarray(p["wa"]) + np.asarray(p["wb"])),
             0.5 * (np.asarray(p["ba"]) + np.asarray(p["bb"]))),
        )
        for k, (wk, bk) in enumerate(heads):
            c0 = k * P
            w[l, :cin, c0:c0 + h] = wk[:, :cin].T
            w[l, P:P + h, c0:c0 + h] = wk[:, cin:].T
            b[l, 0, c0:c0 + h] = bk
    return jnp.asarray(w), jnp.asarray(b)


# --------------------------------- wrapper -----------------------------------
def liquid_block_forward(x, packed, state=None):
    """x: (B, T, IN_FEATURES) float32 -> (readout (B,10), hx (B,20))."""
    B, T, F = x.shape
    assert F == IN_FEATURES
    w_slab, b_slab = packed

    Bp = max(SUBLANE, ((B + SUBLANE - 1) // SUBLANE) * SUBLANE)  # sublane pad

    x_tm = jnp.transpose(x, (1, 0, 2))                           # (T, B, F)
    x_tm = jnp.pad(x_tm, ((0, 0), (0, Bp - B), (0, P - F)))      # (T, Bp, P)
    x2d = x_tm.reshape(T * Bp, P)                                # time-major 2D

    h0 = jnp.zeros((NUM_LAYERS, Bp, P), jnp.float32)
    if state is not None:                                        # (B,20)=[6|4|10]
        off = 0
        for l, h in enumerate(LAYER_SIZES):
            h0 = h0.at[l, :B, :h].set(state[:, off:off + h])
            off += h

    # Single kernel invocation: no grid, all operands whole-array VMEM-resident.
    h_pad = pl.pallas_call(
        _cfc_kernel,
        out_shape=jax.ShapeDtypeStruct((NUM_LAYERS, Bp, P), jnp.float32),
        in_specs=[pl.BlockSpec(memory_space=pltpu.MemorySpace.VMEM)] * 4,
        out_specs=pl.BlockSpec(memory_space=pltpu.MemorySpace.VMEM),
        scratch_shapes=[pltpu.VMEM((T * Bp, W_COLS), jnp.float32)],
    )(x2d, h0, w_slab, b_slab)

    y = h_pad[NUM_LAYERS - 1, :B, :OUT_FEATURES]
    hx = jnp.concatenate(
        [h_pad[l, :B, :LAYER_SIZES[l]] for l in range(NUM_LAYERS)], axis=1)
    return y, hx


# --------------------------- pure-JAX reference ------------------------------
def reference_forward(x, params, state=None):
    B, T, _ = x.shape
    hs = [jnp.zeros((B, h), jnp.float32) for h in LAYER_SIZES]
    if state is not None:
        off = 0
        for l, h in enumerate(LAYER_SIZES):
            hs[l] = state[:, off:off + h]
            off += h
    inp = None
    for t in range(T):
        inp = x[:, t]
        for l, p in enumerate(params):
            xcat = jnp.concatenate([inp, hs[l]], axis=1)
            ff1 = jnp.tanh(xcat @ p["w1"].T + p["b1"])
            ff2 = jnp.tanh(xcat @ p["w2"].T + p["b2"])
            t_a = xcat @ p["wa"].T + p["ba"]
            t_b = xcat @ p["wb"].T + p["bb"]
            sig = jax.nn.sigmoid(t_a * 1.0 + t_b)
            hn = ff1 * (1.0 - sig) + sig * ff2
            hs[l] = hn
            inp = hn
    return inp, jnp.concatenate(hs, axis=1)


# ----------------------------------- main ------------------------------------
if __name__ == "__main__":
    key = jax.random.PRNGKey(0)
    kx, kp, ks = jax.random.split(key, 3)

    B, T = 2, 8
    x = jax.random.normal(kx, (B, T, IN_FEATURES), jnp.float32)

    params = init_params(kp)
    packed = pack_params(params)

    # --- fresh state ---
    y, hx = liquid_block_forward(x, packed, state=None)
    (y, hx) = jax.block_until_ready((y, hx))
    y_ref, hx_ref = reference_forward(x, params, state=None)
    assert y.shape == (B, OUT_FEATURES) and hx.shape == (B, UNITS)
    assert np.allclose(np.asarray(y), np.asarray(y_ref), atol=2e-3, rtol=2e-3)
    assert np.allclose(np.asarray(hx), np.asarray(hx_ref), atol=2e-3, rtol=2e-3)

    # --- provided state (second call, same kernel) ---
    state = 0.1 * jax.random.normal(ks, (B, UNITS), jnp.float32)
    y2, hx2 = liquid_block_forward(x, packed, state=state)
    (y2, hx2) = jax.block_until_ready((y2, hx2))
    y2_ref, hx2_ref = reference_forward(x, params, state=state)
    assert np.allclose(np.asarray(y2), np.asarray(y2_ref), atol=2e-3, rtol=2e-3)
    assert np.allclose(np.asarray(hx2), np.asarray(hx2_ref), atol=2e-3, rtol=2e-3)

    print("KERNEL_OK")
</pallas_src>

<mosaic_0001>
module attributes {stable_mosaic.version = 11 : i64} {
  func.func @_cfc_kernel(%arg0: memref<64x16xf32, #tpu.memory_space<vmem>>, %arg1: memref<3x8x16xf32, #tpu.memory_space<vmem>>, %arg2: memref<3x32x128xf32, #tpu.memory_space<vmem>>, %arg3: memref<3x1x128xf32, #tpu.memory_space<vmem>>, %arg4: memref<3x8x16xf32, #tpu.memory_space<vmem>>, %arg5: memref<64x128xf32, #tpu.memory_space<vmem>>) attributes {dimension_semantics = [], scalar_prefetch = 0 : i64, scratch_operands = 1 : i64, tpu.core_type = #tpu.core_type<tc>} {
    %c0 = arith.constant 0 : index
    %c0_0 = arith.constant 0 : index
    %c0_1 = arith.constant 0 : index
    %0 = vector.load %arg2[%c0, %c0_0, %c0_1] : memref<3x32x128xf32, #tpu.memory_space<vmem>>, vector<1x32x128xf32>
    %1 = vector.shape_cast %0 : vector<1x32x128xf32> to vector<32x128xf32>
    %2 = vector.extract_strided_slice %1 {offsets = [0, 0], sizes = [16, 128], strides = [1, 1]} : vector<32x128xf32> to vector<16x128xf32>
    %3 = vector.extract_strided_slice %1 {offsets = [16, 0], sizes = [16, 128], strides = [1, 1]} : vector<32x128xf32> to vector<16x128xf32>
    %c1 = arith.constant 1 : index
    %c0_2 = arith.constant 0 : index
    %c0_3 = arith.constant 0 : index
    %4 = vector.load %arg2[%c1, %c0_2, %c0_3] : memref<3x32x128xf32, #tpu.memory_space<vmem>>, vector<1x32x128xf32>
    %5 = vector.shape_cast %4 : vector<1x32x128xf32> to vector<32x128xf32>
    %c2 = arith.constant 2 : index
    %c0_4 = arith.constant 0 : index
    %c0_5 = arith.constant 0 : index
    %6 = vector.load %arg2[%c2, %c0_4, %c0_5] : memref<3x32x128xf32, #tpu.memory_space<vmem>>, vector<1x32x128xf32>
    %7 = vector.shape_cast %6 : vector<1x32x128xf32> to vector<32x128xf32>
    %c0_6 = arith.constant 0 : index
    %c0_7 = arith.constant 0 : index
    %c0_8 = arith.constant 0 : index
    %8 = vector.load %arg3[%c0_6, %c0_7, %c0_8] : memref<3x1x128xf32, #tpu.memory_space<vmem>>, vector<1x1x128xf32>
    %9 = vector.shape_cast %8 : vector<1x1x128xf32> to vector<1x128xf32>
    %c1_9 = arith.constant 1 : index
    %c0_10 = arith.constant 0 : index
    %c0_11 = arith.constant 0 : index
    %10 = vector.load %arg3[%c1_9, %c0_10, %c0_11] : memref<3x1x128xf32, #tpu.memory_space<vmem>>, vector<1x1x128xf32>
    %11 = vector.shape_cast %10 : vector<1x1x128xf32> to vector<1x128xf32>
    %12 = vector.shape_cast %11 : vector<1x128xf32> to vector<1x128xf32>
    %13 = vector.broadcast %12 : vector<1x128xf32> to vector<8x128xf32>
    %c2_12 = arith.constant 2 : index
    %c0_13 = arith.constant 0 : index
    %c0_14 = arith.constant 0 : index
    %14 = vector.load %arg3[%c2_12, %c0_13, %c0_14] : memref<3x1x128xf32, #tpu.memory_space<vmem>>, vector<1x1x128xf32>
    %15 = vector.shape_cast %14 : vector<1x1x128xf32> to vector<1x128xf32>
    %16 = vector.shape_cast %15 : vector<1x128xf32> to vector<1x128xf32>
    %17 = vector.broadcast %16 : vector<1x128xf32> to vector<8x128xf32>
    %c0_15 = arith.constant 0 : index
    %c0_16 = arith.constant 0 : index
    %18 = vector.load %arg0[%c0_15, %c0_16] : memref<64x16xf32, #tpu.memory_space<vmem>>, vector<64x16xf32>
    %cst = arith.constant dense<0.000000e+00> : vector<64x128xf32>
    %19 = tpu.matmul %18, %2, %cst {dimension_numbers = #tpu.dot_dimension_numbers<[1], [0], [0], [1], [0, 0, 1, 1], [], []>} : vector<64x16xf32>, vector<16x128xf32>, vector<64x128xf32> -> vector<64x128xf32>
    %20 = vector.broadcast %9 : vector<1x128xf32> to vector<64x128xf32>
    %21 = arith.addf %19, %20 : vector<64x128xf32>
    %c0_17 = arith.constant 0 : index
    %c0_18 = arith.constant 0 : index
    %22 = vector.load %arg5[%c0_17, %c0_18] : memref<64x128xf32, #tpu.memory_space<vmem>>, vector<64x128xf32>
    tpu.vector_store %arg5[%c0_17, %c0_18], %21 {strides = array<i32>} : memref<64x128xf32, #tpu.memory_space<vmem>>, vector<64x128xf32>,
    %c0_19 = arith.constant 0 : index
    %c0_20 = arith.constant 0 : index
    %c0_21 = arith.constant 0 : index
    %23 = vector.load %arg1[%c0_19, %c0_20, %c0_21] : memref<3x8x16xf32, #tpu.memory_space<vmem>>, vector<1x8x16xf32>
    %24 = vector.shape_cast %23 : vector<1x8x16xf32> to vector<8x16xf32>
    %c1_22 = arith.constant 1 : index
    %c0_23 = arith.constant 0 : index
    %c0_24 = arith.constant 0 : index
    %25 = vector.load %arg1[%c1_22, %c0_23, %c0_24] : memref<3x8x16xf32, #tpu.memory_space<vmem>>, vector<1x8x16xf32>
    %26 = vector.shape_cast %25 : vector<1x8x16xf32> to vector<8x16xf32>
    %c2_25 = arith.constant 2 : index
    %c0_26 = arith.constant 0 : index
    %c0_27 = arith.constant 0 : index
    %27 = vector.load %arg1[%c2_25, %c0_26, %c0_27] : memref<3x8x16xf32, #tpu.memory_space<vmem>>, vector<1x8x16xf32>
    %28 = vector.shape_cast %27 : vector<1x8x16xf32> to vector<8x16xf32>
    %c0_i32 = arith.constant 0 : i32
    %c8_i32 = arith.constant 8 : i32
    %29 = arith.muli %c0_i32, %c8_i32 : i32
    %30 = tpu.assume_multiple %29, 8 : i32
    %31 = arith.index_cast %30 : i32 to index
    %c0_28 = arith.constant 0 : index
    %32 = vector.load %arg5[%31, %c0_28] : memref<64x128xf32, #tpu.memory_space<vmem>>, vector<8x128xf32>
    %cst_29 = arith.constant dense<0.000000e+00> : vector<8x128xf32>
    %33 = tpu.matmul %24, %3, %cst_29 {dimension_numbers = #tpu.dot_dimension_numbers<[1], [0], [0], [1], [0, 0, 1, 1], [], []>} : vector<8x16xf32>, vector<16x128xf32>, vector<8x128xf32> -> vector<8x128xf32>
    %34 = arith.addf %32, %33 : vector<8x128xf32>
    %35 = math.tanh %34 : vector<8x128xf32>
    %36 = vector.extract_strided_slice %35 {offsets = [0, 0], sizes = [8, 16], strides = [1, 1]} : vector<8x128xf32> to vector<8x16xf32>
    %37 = vector.extract_strided_slice %35 {offsets = [0, 16], sizes = [8, 16], strides = [1, 1]} : vector<8x128xf32> to vector<8x16xf32>
    %38 = vector.extract_strided_slice %35 {offsets = [0, 32], sizes = [8, 16], strides = [1, 1]} : vector<8x128xf32> to vector<8x16xf32>
    %cst_30 = arith.constant 5.000000e-01 : f32
    %39 = vector.broadcast %cst_30 : f32 to vector<8x16xf32>
    %40 = arith.mulf %39, %38 : vector<8x16xf32>
    %cst_31 = arith.constant 5.000000e-01 : f32
    %41 = vector.broadcast %cst_31 : f32 to vector<8x16xf32>
    %42 = arith.addf %40, %41 : vector<8x16xf32>
    %43 = arith.subf %37, %36 : vector<8x16xf32>
    %44 = arith.mulf %42, %43 : vector<8x16xf32>
    %45 = arith.addf %36, %44 : vector<8x16xf32>
    %46 = tpu.concatenate %45, %26 in 1 : vector<8x16xf32>, vector<8x16xf32> -> vector<8x32xf32>
    %cst_32 = arith.constant dense<0.000000e+00> : vector<8x128xf32>
    %47 = tpu.matmul %46, %5, %cst_32 {dimension_numbers = #tpu.dot_dimension_numbers<[1], [0], [0], [1], [0, 0, 1, 1], [], []>} : vector<8x32xf32>, vector<32x128xf32>, vector<8x128xf32> -> vector<8x128xf32>
    %48 = arith.addf %47, %13 : vector<8x128xf32>
    %49 = math.tanh %48 : vector<8x128xf32>
    %50 = vector.extract_strided_slice %49 {offsets = [0, 0], sizes = [8, 16], strides = [1, 1]} : vector<8x128xf32> to vector<8x16xf32>
    %51 = vector.extract_strided_slice %49 {offsets = [0, 16], sizes = [8, 16], strides = [1, 1]} : vector<8x128xf32> to vector<8x16xf32>
    %52 = vector.extract_strided_slice %49 {offsets = [0, 32], sizes = [8, 16], strides = [1, 1]} : vector<8x128xf32> to vector<8x16xf32>
    %cst_33 = arith.constant 5.000000e-01 : f32
    %53 = vector.broadcast %cst_33 : f32 to vector<8x16xf32>
    %54 = arith.mulf %53, %52 : vector<8x16xf32>
    %cst_34 = arith.constant 5.000000e-01 : f32
    %55 = vector.broadcast %cst_34 : f32 to vector<8x16xf32>
    %56 = arith.addf %54, %55 : vector<8x16xf32>
    %57 = arith.subf %51, %50 : vector<8x16xf32>
    %58 = arith.mulf %56, %57 : vector<8x16xf32>
    %59 = arith.addf %50, %58 : vector<8x16xf32>
    %60 = tpu.concatenate %59, %28 in 1 : vector<8x16xf32>, vector<8x16xf32> -> vector<8x32xf32>
    %cst_35 = arith.constant dense<0.000000e+00> : vector<8x128xf32>
    %61 = tpu.matmul %60, %7, %cst_35 {dimension_numbers = #tpu.dot_dimension_numbers<[1], [0], [0], [1], [0, 0, 1, 1], [], []>} : vector<8x32xf32>, vector<32x128xf32>, vector<8x128xf32> -> vector<8x128xf32>
    %62 = arith.addf %61, %17 : vector<8x128xf32>
    %63 = math.tanh %62 : vector<8x128xf32>
    %64 = vector.extract_strided_slice %63 {offsets = [0, 0], sizes = [8, 16], strides = [1, 1]} : vector<8x128xf32> to vector<8x16xf32>
    %65 = vector.extract_strided_slice %63 {offsets = [0, 16], sizes = [8, 16], strides = [1, 1]} : vector<8x128xf32> to vector<8x16xf32>
    %66 = vector.extract_strided_slice %63 {offsets = [0, 32], sizes = [8, 16], strides = [1, 1]} : vector<8x128xf32> to vector<8x16xf32>
    %cst_36 = arith.constant 5.000000e-01 : f32
    %67 = vector.broadcast %cst_36 : f32 to vector<8x16xf32>
    %68 = arith.mulf %67, %66 : vector<8x16xf32>
    %cst_37 = arith.constant 5.000000e-01 : f32
    %69 = vector.broadcast %cst_37 : f32 to vector<8x16xf32>
    %70 = arith.addf %68, %69 : vector<8x16xf32>
    %71 = arith.subf %65, %64 : vector<8x16xf32>
    %72 = arith.mulf %70, %71 : vector<8x16xf32>
    %73 = arith.addf %64, %72 : vector<8x16xf32>
    %c1_i32 = arith.constant 1 : i32
    %c8_i32_38 = arith.constant 8 : i32
    %74 = arith.muli %c1_i32, %c8_i32_38 : i32
    %75 = tpu.assume_multiple %74, 8 : i32
    %76 = arith.index_cast %75 : i32 to index
    %c0_39 = arith.constant 0 : index
    %77 = vector.load %arg5[%76, %c0_39] : memref<64x128xf32, #tpu.memory_space<vmem>>, vector<8x128xf32>
    %cst_40 = arith.constant dense<0.000000e+00> : vector<8x128xf32>
    %78 = tpu.matmul %45, %3, %cst_40 {dimension_numbers = #tpu.dot_dimension_numbers<[1], [0], [0], [1], [0, 0, 1, 1], [], []>} : vector<8x16xf32>, vector<16x128xf32>, vector<8x128xf32> -> vector<8x128xf32>
    %79 = arith.addf %77, %78 : vector<8x128xf32>
    %80 = math.tanh %79 : vector<8x128xf32>
    %81 = vector.extract_strided_slice %80 {offsets = [0, 0], sizes = [8, 16], strides = [1, 1]} : vector<8x128xf32> to vector<8x16xf32>
    %82 = vector.extract_strided_slice %80 {offsets = [0, 16], sizes = [8, 16], strides = [1, 1]} : vector<8x128xf32> to vector<8x16xf32>
    %83 = vector.extract_strided_slice %80 {offsets = [0, 32], sizes = [8, 16], strides = [1, 1]} : vector<8x128xf32> to vector<8x16xf32>
    %cst_41 = arith.constant 5.000000e-01 : f32
    %84 = vector.broadcast %cst_41 : f32 to vector<8x16xf32>
    %85 = arith.mulf %84, %83 : vector<8x16xf32>
    %cst_42 = arith.constant 5.000000e-01 : f32
    %86 = vector.broadcast %cst_42 : f32 to vector<8x16xf32>
    %87 = arith.addf %85, %86 : vector<8x16xf32>
    %88 = arith.subf %82, %81 : vector<8x16xf32>
    %89 = arith.mulf %87, %88 : vector<8x16xf32>
    %90 = arith.addf %81, %89 : vector<8x16xf32>
    %91 = tpu.concatenate %90, %59 in 1 : vector<8x16xf32>, vector<8x16xf32> -> vector<8x32xf32>
    %cst_43 = arith.constant dense<0.000000e+00> : vector<8x128xf32>
    %92 = tpu.matmul %91, %5, %cst_43 {dimension_numbers = #tpu.dot_dimension_numbers<[1], [0], [0], [1], [0, 0, 1, 1], [], []>} : vector<8x32xf32>, vector<32x128xf32>, vector<8x128xf32> -> vector<8x128xf32>
    %93 = arith.addf %92, %13 : vector<8x128xf32>
    %94 = math.tanh %93 : vector<8x128xf32>
    %95 = vector.extract_strided_slice %94 {offsets = [0, 0], sizes = [8, 16], strides = [1, 1]} : vector<8x128xf32> to vector<8x16xf32>
    %96 = vector.extract_strided_slice %94 {offsets = [0, 16], sizes = [8, 16], strides = [1, 1]} : vector<8x128xf32> to vector<8x16xf32>
    %97 = vector.extract_strided_slice %94 {offsets = [0, 32], sizes = [8, 16], strides = [1, 1]} : vector<8x128xf32> to vector<8x16xf32>
    %cst_44 = arith.constant 5.000000e-01 : f32
    %98 = vector.broadcast %cst_44 : f32 to vector<8x16xf32>
    %99 = arith.mulf %98, %97 : vector<8x16xf32>
    %cst_45 = arith.constant 5.000000e-01 : f32
    %100 = vector.broadcast %cst_45 : f32 to vector<8x16xf32>
    %101 = arith.addf %99, %100 : vector<8x16xf32>
    %102 = arith.subf %96, %95 : vector<8x16xf32>
    %103 = arith.mulf %101, %102 : vector<8x16xf32>
    %104 = arith.addf %95, %103 : vector<8x16xf32>
    %105 = tpu.concatenate %104, %73 in 1 : vector<8x16xf32>, vector<8x16xf32> -> vector<8x32xf32>
    %cst_46 = arith.constant dense<0.000000e+00> : vector<8x128xf32>
    %106 = tpu.matmul %105, %7, %cst_46 {dimension_numbers = #tpu.dot_dimension_numbers<[1], [0], [0], [1], [0, 0, 1, 1], [], []>} : vector<8x32xf32>, vector<32x128xf32>, vector<8x128xf32> -> vector<8x128xf32>
    %107 = arith.addf %106, %17 : vector<8x128xf32>
    %108 = math.tanh %107 : vector<8x128xf32>
    %109 = vector.extract_strided_slice %108 {offsets = [0, 0], sizes = [8, 16], strides = [1, 1]} : vector<8x128xf32> to vector<8x16xf32>
    %110 = vector.extract_strided_slice %108 {offsets = [0, 16], sizes = [8, 16], strides = [1, 1]} : vector<8x128xf32> to vector<8x16xf32>
    %111 = vector.extract_strided_slice %108 {offsets = [0, 32], sizes = [8, 16], strides = [1, 1]} : vector<8x128xf32> to vector<8x16xf32>
    %cst_47 = arith.constant 5.000000e-01 : f32
    %112 = vector.broadcast %cst_47 : f32 to vector<8x16xf32>
    %113 = arith.mulf %112, %111 : vector<8x16xf32>
    %cst_48 = arith.constant 5.000000e-01 : f32
    %114 = vector.broadcast %cst_48 : f32 to vector<8x16xf32>
    %115 = arith.addf %113, %114 : vector<8x16xf32>
    %116 = arith.subf %110, %109 : vector<8x16xf32>
    %117 = arith.mulf %115, %116 : vector<8x16xf32>
    %118 = arith.addf %109, %117 : vector<8x16xf32>
    %c2_i32 = arith.constant 2 : i32
    %c8_i32_49 = arith.constant 8 : i32
    %119 = arith.muli %c2_i32, %c8_i32_49 : i32
    %120 = tpu.assume_multiple %119, 8 : i32
    %121 = arith.index_cast %120 : i32 to index
    %c0_50 = arith.constant 0 : index
    %122 = vector.load %arg5[%121, %c0_50] : memref<64x128xf32, #tpu.memory_space<vmem>>, vector<8x128xf32>
    %cst_51 = arith.constant dense<0.000000e+00> : vector<8x128xf32>
    %123 = tpu.matmul %90, %3, %cst_51 {dimension_numbers = #tpu.dot_dimension_numbers<[1], [0], [0], [1], [0, 0, 1, 1], [], []>} : vector<8x16xf32>, vector<16x128xf32>, vector<8x128xf32> -> vector<8x128xf32>
    %124 = arith.addf %122, %123 : vector<8x128xf32>
    %125 = math.tanh %124 : vector<8x128xf32>
    %126 = vector.extract_strided_slice %125 {offsets = [0, 0], sizes = [8, 16], strides = [1, 1]} : vector<8x128xf32> to vector<8x16xf32>
    %127 = vector.extract_strided_slice %125 {offsets = [0, 16], sizes = [8, 16], strides = [1, 1]} : vector<8x128xf32> to vector<8x16xf32>
    %128 = vector.extract_strided_slice %125 {offsets = [0, 32], sizes = [8, 16], strides = [1, 1]} : vector<8x128xf32> to vector<8x16xf32>
    %cst_52 = arith.constant 5.000000e-01 : f32
    %129 = vector.broadcast %cst_52 : f32 to vector<8x16xf32>
    %130 = arith.mulf %129, %128 : vector<8x16xf32>
    %cst_53 = arith.constant 5.000000e-01 : f32
    %131 = vector.broadcast %cst_53 : f32 to vector<8x16xf32>
    %132 = arith.addf %130, %131 : vector<8x16xf32>
    %133 = arith.subf %127, %126 : vector<8x16xf32>
    %134 = arith.mulf %132, %133 : vector<8x16xf32>
    %135 = arith.addf %126, %134 : vector<8x16xf32>
    %136 = tpu.concatenate %135, %104 in 1 : vector<8x16xf32>, vector<8x16xf32> -> vector<8x32xf32>
    %cst_54 = arith.constant dense<0.000000e+00> : vector<8x128xf32>
    %137 = tpu.matmul %136, %5, %cst_54 {dimension_numbers = #tpu.dot_dimension_numbers<[1], [0], [0], [1], [0, 0, 1, 1], [], []>} : vector<8x32xf32>, vector<32x128xf32>, vector<8x128xf32> -> vector<8x128xf32>
    %138 = arith.addf %137, %13 : vector<8x128xf32>
    %139 = math.tanh %138 : vector<8x128xf32>
    %140 = vector.extract_strided_slice %139 {offsets = [0, 0], sizes = [8, 16], strides = [1, 1]} : vector<8x128xf32> to vector<8x16xf32>
    %141 = vector.extract_strided_slice %139 {offsets = [0, 16], sizes = [8, 16], strides = [1, 1]} : vector<8x128xf32> to vector<8x16xf32>
    %142 = vector.extract_strided_slice %139 {offsets = [0, 32], sizes = [8, 16], strides = [1, 1]} : vector<8x128xf32> to vector<8x16xf32>
    %cst_55 = arith.constant 5.000000e-01 : f32
    %143 = vector.broadcast %cst_55 : f32 to vector<8x16xf32>
    %144 = arith.mulf %143, %142 : vector<8x16xf32>
    %cst_56 = arith.constant 5.000000e-01 : f32
    %145 = vector.broadcast %cst_56 : f32 to vector<8x16xf32>
    %146 = arith.addf %144, %145 : vector<8x16xf32>
    %147 = arith.subf %141, %140 : vector<8x16xf32>
    %148 = arith.mulf %146, %147 : vector<8x16xf32>
    %149 = arith.addf %140, %148 : vector<8x16xf32>
    %150 = tpu.concatenate %149, %118 in 1 : vector<8x16xf32>, vector<8x16xf32> -> vector<8x32xf32>
    %cst_57 = arith.constant dense<0.000000e+00> : vector<8x128xf32>
    %151 = tpu.matmul %150, %7, %cst_57 {dimension_numbers = #tpu.dot_dimension_numbers<[1], [0], [0], [1], [0, 0, 1, 1], [], []>} : vector<8x32xf32>, vector<32x128xf32>, vector<8x128xf32> -> vector<8x128xf32>
    %152 = arith.addf %151, %17 : vector<8x128xf32>
    %153 = math.tanh %152 : vector<8x128xf32>
    %154 = vector.extract_strided_slice %153 {offsets = [0, 0], sizes = [8, 16], strides = [1, 1]} : vector<8x128xf32> to vector<8x16xf32>
    %155 = vector.extract_strided_slice %153 {offsets = [0, 16], sizes = [8, 16], strides = [1, 1]} : vector<8x128xf32> to vector<8x16xf32>
    %156 = vector.extract_strided_slice %153 {offsets = [0, 32], sizes = [8, 16], strides = [1, 1]} : vector<8x128xf32> to vector<8x16xf32>
    %cst_58 = arith.constant 5.000000e-01 : f32
    %157 = vector.broadcast %cst_58 : f32 to vector<8x16xf32>
    %158 = arith.mulf %157, %156 : vector<8x16xf32>
    %cst_59 = arith.constant 5.000000e-01 : f32
    %159 = vector.broadcast %cst_59 : f32 to vector<8x16xf32>
    %160 = arith.addf %158, %159 : vector<8x16xf32>
    %161 = arith.subf %155, %154 : vector<8x16xf32>
    %162 = arith.mulf %160, %161 : vector<8x16xf32>
    %163 = arith.addf %154, %162 : vector<8x16xf32>
    %c3_i32 = arith.constant 3 : i32
    %c8_i32_60 = arith.constant 8 : i32
    %164 = arith.muli %c3_i32, %c8_i32_60 : i32
    %165 = tpu.assume_multiple %164, 8 : i32
    %166 = arith.index_cast %165 : i32 to index
    %c0_61 = arith.constant 0 : index
    %167 = vector.load %arg5[%166, %c0_61] : memref<64x128xf32, #tpu.memory_space<vmem>>, vector<8x128xf32>
    %cst_62 = arith.constant dense<0.000000e+00> : vector<8x128xf32>
    %168 = tpu.matmul %135, %3, %cst_62 {dimension_numbers = #tpu.dot_dimension_numbers<[1], [0], [0], [1], [0, 0, 1, 1], [], []>} : vector<8x16xf32>, vector<16x128xf32>, vector<8x128xf32> -> vector<8x128xf32>
    %169 = arith.addf %167, %168 : vector<8x128xf32>
    %170 = math.tanh %169 : vector<8x128xf32>
    %171 = vector.extract_strided_slice %170 {offsets = [0, 0], sizes = [8, 16], strides = [1, 1]} : vector<8x128xf32> to vector<8x16xf32>
    %172 = vector.extract_strided_slice %170 {offsets = [0, 16], sizes = [8, 16], strides = [1, 1]} : vector<8x128xf32> to vector<8x16xf32>
    %173 = vector.extract_strided_slice %170 {offsets = [0, 32], sizes = [8, 16], strides = [1, 1]} : vector<8x128xf32> to vector<8x16xf32>
    %cst_63 = arith.constant 5.000000e-01 : f32
    %174 = vector.broadcast %cst_63 : f32 to vector<8x16xf32>
    %175 = arith.mulf %174, %173 : vector<8x16xf32>
    %cst_64 = arith.constant 5.000000e-01 : f32
    %176 = vector.broadcast %cst_64 : f32 to vector<8x16xf32>
    %177 = arith.addf %175, %176 : vector<8x16xf32>
    %178 = arith.subf %172, %171 : vector<8x16xf32>
    %179 = arith.mulf %177, %178 : vector<8x16xf32>
    %180 = arith.addf %171, %179 : vector<8x16xf32>
    %181 = tpu.concatenate %180, %149 in 1 : vector<8x16xf32>, vector<8x16xf32> -> vector<8x32xf32>
    %cst_65 = arith.constant dense<0.000000e+00> : vector<8x128xf32>
    %182 = tpu.matmul %181, %5, %cst_65 {dimension_numbers = #tpu.dot_dimension_numbers<[1], [0], [0], [1], [0, 0, 1, 1], [], []>} : vector<8x32xf32>, vector<32x128xf32>, vector<8x128xf32> -> vector<8x128xf32>
    %183 = arith.addf %182, %13 : vector<8x128xf32>
    %184 = math.tanh %183 : vector<8x128xf32>
    %185 = vector.extract_strided_slice %184 {offsets = [0, 0], sizes = [8, 16], strides = [1, 1]} : vector<8x128xf32> to vector<8x16xf32>
    %186 = vector.extract_strided_slice %184 {offsets = [0, 16], sizes = [8, 16], strides = [1, 1]} : vector<8x128xf32> to vector<8x16xf32>
    %187 = vector.extract_strided_slice %184 {offsets = [0, 32], sizes = [8, 16], strides = [1, 1]} : vector<8x128xf32> to vector<8x16xf32>
    %cst_66 = arith.constant 5.000000e-01 : f32
    %188 = vector.broadcast %cst_66 : f32 to vector<8x16xf32>
    %189 = arith.mulf %188, %187 : vector<8x16xf32>
    %cst_67 = arith.constant 5.000000e-01 : f32
    %190 = vector.broadcast %cst_67 : f32 to vector<8x16xf32>
    %191 = arith.addf %189, %190 : vector<8x16xf32>
    %192 = arith.subf %186, %185 : vector<8x16xf32>
    %193 = arith.mulf %191, %192 : vector<8x16xf32>
    %194 = arith.addf %185, %193 : vector<8x16xf32>
    %195 = tpu.concatenate %194, %163 in 1 : vector<8x16xf32>, vector<8x16xf32> -> vector<8x32xf32>
    %cst_68 = arith.constant dense<0.000000e+00> : vector<8x128xf32>
    %196 = tpu.matmul %195, %7, %cst_68 {dimension_numbers = #tpu.dot_dimension_numbers<[1], [0], [0], [1], [0, 0, 1, 1], [], []>} : vector<8x32xf32>, vector<32x128xf32>, vector<8x128xf32> -> vector<8x128xf32>
    %197 = arith.addf %196, %17 : vector<8x128xf32>
    %198 = math.tanh %197 : vector<8x128xf32>
    %199 = vector.extract_strided_slice %198 {offsets = [0, 0], sizes = [8, 16], strides = [1, 1]} : vector<8x128xf32> to vector<8x16xf32>
    %200 = vector.extract_strided_slice %198 {offsets = [0, 16], sizes = [8, 16], strides = [1, 1]} : vector<8x128xf32> to vector<8x16xf32>
    %201 = vector.extract_strided_slice %198 {offsets = [0, 32], sizes = [8, 16], strides = [1, 1]} : vector<8x128xf32> to vector<8x16xf32>
    %cst_69 = arith.constant 5.000000e-01 : f32
    %202 = vector.broadcast %cst_69 : f32 to vector<8x16xf32>
    %203 = arith.mulf %202, %201 : vector<8x16xf32>
    %cst_70 = arith.constant 5.000000e-01 : f32
    %204 = vector.broadcast %cst_70 : f32 to vector<8x16xf32>
    %205 = arith.addf %203, %204 : vector<8x16xf32>
    %206 = arith.subf %200, %199 : vector<8x16xf32>
    %207 = arith.mulf %205, %206 : vector<8x16xf32>
    %208 = arith.addf %199, %207 : vector<8x16xf32>
    %c4_i32 = arith.constant 4 : i32
    %c8_i32_71 = arith.constant 8 : i32
    %209 = arith.muli %c4_i32, %c8_i32_71 : i32
    %210 = tpu.assume_multiple %209, 8 : i32
    %211 = arith.index_cast %210 : i32 to index
    %c0_72 = arith.constant 0 : index
    %212 = vector.load %arg5[%211, %c0_72] : memref<64x128xf32, #tpu.memory_space<vmem>>, vector<8x128xf32>
    %cst_73 = arith.constant dense<0.000000e+00> : vector<8x128xf32>
    %213 = tpu.matmul %180, %3, %cst_73 {dimension_numbers = #tpu.dot_dimension_numbers<[1], [0], [0], [1], [0, 0, 1, 1], [], []>} : vector<8x16xf32>, vector<16x128xf32>, vector<8x128xf32> -> vector<8x128xf32>
    %214 = arith.addf %212, %213 : vector<8x128xf32>
    %215 = math.tanh %214 : vector<8x128xf32>
    %216 = vector.extract_strided_slice %215 {offsets = [0, 0], sizes = [8, 16], strides = [1, 1]} : vector<8x128xf32> to vector<8x16xf32>
    %217 = vector.extract_strided_slice %215 {offsets = [0, 16], sizes = [8, 16], strides = [1, 1]} : vector<8x128xf32> to vector<8x16xf32>
    %218 = vector.extract_strided_slice %215 {offsets = [0, 32], sizes = [8, 16], strides = [1, 1]} : vector<8x128xf32> to vector<8x16xf32>
    %cst_74 = arith.constant 5.000000e-01 : f32
    %219 = vector.broadcast %cst_74 : f32 to vector<8x16xf32>
    %220 = arith.mulf %219, %218 : vector<8x16xf32>
    %cst_75 = arith.constant 5.000000e-01 : f32
    %221 = vector.broadcast %cst_75 : f32 to vector<8x16xf32>
    %222 = arith.addf %220, %221 : vector<8x16xf32>
    %223 = arith.subf %217, %216 : vector<8x16xf32>
    %224 = arith.mulf %222, %223 : vector<8x16xf32>
    %225 = arith.addf %216, %224 : vector<8x16xf32>
    %226 = tpu.concatenate %225, %194 in 1 : vector<8x16xf32>, vector<8x16xf32> -> vector<8x32xf32>
    %cst_76 = arith.constant dense<0.000000e+00> : vector<8x128xf32>
    %227 = tpu.matmul %226, %5, %cst_76 {dimension_numbers = #tpu.dot_dimension_numbers<[1], [0], [0], [1], [0, 0, 1, 1], [], []>} : vector<8x32xf32>, vector<32x128xf32>, vector<8x128xf32> -> vector<8x128xf32>
    %228 = arith.addf %227, %13 : vector<8x128xf32>
    %229 = math.tanh %228 : vector<8x128xf32>
    %230 = vector.extract_strided_slice %229 {offsets = [0, 0], sizes = [8, 16], strides = [1, 1]} : vector<8x128xf32> to vector<8x16xf32>
    %231 = vector.extract_strided_slice %229 {offsets = [0, 16], sizes = [8, 16], strides = [1, 1]} : vector<8x128xf32> to vector<8x16xf32>
    %232 = vector.extract_strided_slice %229 {offsets = [0, 32], sizes = [8, 16], strides = [1, 1]} : vector<8x128xf32> to vector<8x16xf32>
    %cst_77 = arith.constant 5.000000e-01 : f32
    %233 = vector.broadcast %cst_77 : f32 to vector<8x16xf32>
    %234 = arith.mulf %233, %232 : vector<8x16xf32>
    %cst_78 = arith.constant 5.000000e-01 : f32
    %235 = vector.broadcast %cst_78 : f32 to vector<8x16xf32>
    %236 = arith.addf %234, %235 : vector<8x16xf32>
    %237 = arith.subf %231, %230 : vector<8x16xf32>
    %238 = arith.mulf %236, %237 : vector<8x16xf32>
    %239 = arith.addf %230, %238 : vector<8x16xf32>
    %240 = tpu.concatenate %239, %208 in 1 : vector<8x16xf32>, vector<8x16xf32> -> vector<8x32xf32>
    %cst_79 = arith.constant dense<0.000000e+00> : vector<8x128xf32>
    %241 = tpu.matmul %240, %7, %cst_79 {dimension_numbers = #tpu.dot_dimension_numbers<[1], [0], [0], [1], [0, 0, 1, 1], [], []>} : vector<8x32xf32>, vector<32x128xf32>, vector<8x128xf32> -> vector<8x128xf32>
    %242 = arith.addf %241, %17 : vector<8x128xf32>
    %243 = math.tanh %242 : vector<8x128xf32>
    %244 = vector.extract_strided_slice %243 {offsets = [0, 0], sizes = [8, 16], strides = [1, 1]} : vector<8x128xf32> to vector<8x16xf32>
    %245 = vector.extract_strided_slice %243 {offsets = [0, 16], sizes = [8, 16], strides = [1, 1]} : vector<8x128xf32> to vector<8x16xf32>
    %246 = vector.extract_strided_slice %243 {offsets = [0, 32], sizes = [8, 16], strides = [1, 1]} : vector<8x128xf32> to vector<8x16xf32>
    %cst_80 = arith.constant 5.000000e-01 : f32
    %247 = vector.broadcast %cst_80 : f32 to vector<8x16xf32>
    %248 = arith.mulf %247, %246 : vector<8x16xf32>
    %cst_81 = arith.constant 5.000000e-01 : f32
    %249 = vector.broadcast %cst_81 : f32 to vector<8x16xf32>
    %250 = arith.addf %248, %249 : vector<8x16xf32>
    %251 = arith.subf %245, %244 : vector<8x16xf32>
    %252 = arith.mulf %250, %251 : vector<8x16xf32>
    %253 = arith.addf %244, %252 : vector<8x16xf32>
    %c5_i32 = arith.constant 5 : i32
    %c8_i32_82 = arith.constant 8 : i32
    %254 = arith.muli %c5_i32, %c8_i32_82 : i32
    %255 = tpu.assume_multiple %254, 8 : i32
    %256 = arith.index_cast %255 : i32 to index
    %c0_83 = arith.constant 0 : index
    %257 = vector.load %arg5[%256, %c0_83] : memref<64x128xf32, #tpu.memory_space<vmem>>, vector<8x128xf32>
    %cst_84 = arith.constant dense<0.000000e+00> : vector<8x128xf32>
    %258 = tpu.matmul %225, %3, %cst_84 {dimension_numbers = #tpu.dot_dimension_numbers<[1], [0], [0], [1], [0, 0, 1, 1], [], []>} : vector<8x16xf32>, vector<16x128xf32>, vector<8x128xf32> -> vector<8x128xf32>
    %259 = arith.addf %257, %258 : vector<8x128xf32>
    %260 = math.tanh %259 : vector<8x128xf32>
    %261 = vector.extract_strided_slice %260 {offsets = [0, 0], sizes = [8, 16], strides = [1, 1]} : vector<8x128xf32> to vector<8x16xf32>
    %262 = vector.extract_strided_slice %260 {offsets = [0, 16], sizes = [8, 16], strides = [1, 1]} : vector<8x128xf32> to vector<8x16xf32>
    %263 = vector.extract_strided_slice %260 {offsets = [0, 32], sizes = [8, 16], strides = [1, 1]} : vector<8x128xf32> to vector<8x16xf32>
    %cst_85 = arith.constant 5.000000e-01 : f32
    %264 = vector.broadcast %cst_85 : f32 to vector<8x16xf32>
    %265 = arith.mulf %264, %263 : vector<8x16xf32>
    %cst_86 = arith.constant 5.000000e-01 : f32
    %266 = vector.broadcast %cst_86 : f32 to vector<8x16xf32>
    %267 = arith.addf %265, %266 : vector<8x16xf32>
    %268 = arith.subf %262, %261 : vector<8x16xf32>
    %269 = arith.mulf %267, %268 : vector<8x16xf32>
    %270 = arith.addf %261, %269 : vector<8x16xf32>
    %271 = tpu.concatenate %270, %239 in 1 : vector<8x16xf32>, vector<8x16xf32> -> vector<8x32xf32>
    %cst_87 = arith.constant dense<0.000000e+00> : vector<8x128xf32>
    %272 = tpu.matmul %271, %5, %cst_87 {dimension_numbers = #tpu.dot_dimension_numbers<[1], [0], [0], [1], [0, 0, 1, 1], [], []>} : vector<8x32xf32>, vector<32x128xf32>, vector<8x128xf32> -> vector<8x128xf32>
    %273 = arith.addf %272, %13 : vector<8x128xf32>
    %274 = math.tanh %273 : vector<8x128xf32>
    %275 = vector.extract_strided_slice %274 {offsets = [0, 0], sizes = [8, 16], strides = [1, 1]} : vector<8x128xf32> to vector<8x16xf32>
    %276 = vector.extract_strided_slice %274 {offsets = [0, 16], sizes = [8, 16], strides = [1, 1]} : vector<8x128xf32> to vector<8x16xf32>
    %277 = vector.extract_strided_slice %274 {offsets = [0, 32], sizes = [8, 16], strides = [1, 1]} : vector<8x128xf32> to vector<8x16xf32>
    %cst_88 = arith.constant 5.000000e-01 : f32
    %278 = vector.broadcast %cst_88 : f32 to vector<8x16xf32>
    %279 = arith.mulf %278, %277 : vector<8x16xf32>
    %cst_89 = arith.constant 5.000000e-01 : f32
    %280 = vector.broadcast %cst_89 : f32 to vector<8x16xf32>
    %281 = arith.addf %279, %280 : vector<8x16xf32>
    %282 = arith.subf %276, %275 : vector<8x16xf32>
    %283 = arith.mulf %281, %282 : vector<8x16xf32>
    %284 = arith.addf %275, %283 : vector<8x16xf32>
    %285 = tpu.concatenate %284, %253 in 1 : vector<8x16xf32>, vector<8x16xf32> -> vector<8x32xf32>
    %cst_90 = arith.constant dense<0.000000e+00> : vector<8x128xf32>
    %286 = tpu.matmul %285, %7, %cst_90 {dimension_numbers = #tpu.dot_dimension_numbers<[1], [0], [0], [1], [0, 0, 1, 1], [], []>} : vector<8x32xf32>, vector<32x128xf32>, vector<8x128xf32> -> vector<8x128xf32>
    %287 = arith.addf %286, %17 : vector<8x128xf32>
    %288 = math.tanh %287 : vector<8x128xf32>
    %289 = vector.extract_strided_slice %288 {offsets = [0, 0], sizes = [8, 16], strides = [1, 1]} : vector<8x128xf32> to vector<8x16xf32>
    %290 = vector.extract_strided_slice %288 {offsets = [0, 16], sizes = [8, 16], strides = [1, 1]} : vector<8x128xf32> to vector<8x16xf32>
    %291 = vector.extract_strided_slice %288 {offsets = [0, 32], sizes = [8, 16], strides = [1, 1]} : vector<8x128xf32> to vector<8x16xf32>
    %cst_91 = arith.constant 5.000000e-01 : f32
    %292 = vector.broadcast %cst_91 : f32 to vector<8x16xf32>
    %293 = arith.mulf %292, %291 : vector<8x16xf32>
    %cst_92 = arith.constant 5.000000e-01 : f32
    %294 = vector.broadcast %cst_92 : f32 to vector<8x16xf32>
    %295 = arith.addf %293, %294 : vector<8x16xf32>
    %296 = arith.subf %290, %289 : vector<8x16xf32>
    %297 = arith.mulf %295, %296 : vector<8x16xf32>
    %298 = arith.addf %289, %297 : vector<8x16xf32>
    %c6_i32 = arith.constant 6 : i32
    %c8_i32_93 = arith.constant 8 : i32
    %299 = arith.muli %c6_i32, %c8_i32_93 : i32
    %300 = tpu.assume_multiple %299, 8 : i32
    %301 = arith.index_cast %300 : i32 to index
    %c0_94 = arith.constant 0 : index
    %302 = vector.load %arg5[%301, %c0_94] : memref<64x128xf32, #tpu.memory_space<vmem>>, vector<8x128xf32>
    %cst_95 = arith.constant dense<0.000000e+00> : vector<8x128xf32>
    %303 = tpu.matmul %270, %3, %cst_95 {dimension_numbers = #tpu.dot_dimension_numbers<[1], [0], [0], [1], [0, 0, 1, 1], [], []>} : vector<8x16xf32>, vector<16x128xf32>, vector<8x128xf32> -> vector<8x128xf32>
    %304 = arith.addf %302, %303 : vector<8x128xf32>
    %305 = math.tanh %304 : vector<8x128xf32>
    %306 = vector.extract_strided_slice %305 {offsets = [0, 0], sizes = [8, 16], strides = [1, 1]} : vector<8x128xf32> to vector<8x16xf32>
    %307 = vector.extract_strided_slice %305 {offsets = [0, 16], sizes = [8, 16], strides = [1, 1]} : vector<8x128xf32> to vector<8x16xf32>
    %308 = vector.extract_strided_slice %305 {offsets = [0, 32], sizes = [8, 16], strides = [1, 1]} : vector<8x128xf32> to vector<8x16xf32>
    %cst_96 = arith.constant 5.000000e-01 : f32
    %309 = vector.broadcast %cst_96 : f32 to vector<8x16xf32>
    %310 = arith.mulf %309, %308 : vector<8x16xf32>
    %cst_97 = arith.constant 5.000000e-01 : f32
    %311 = vector.broadcast %cst_97 : f32 to vector<8x16xf32>
    %312 = arith.addf %310, %311 : vector<8x16xf32>
    %313 = arith.subf %307, %306 : vector<8x16xf32>
    %314 = arith.mulf %312, %313 : vector<8x16xf32>
    %315 = arith.addf %306, %314 : vector<8x16xf32>
    %316 = tpu.concatenate %315, %284 in 1 : vector<8x16xf32>, vector<8x16xf32> -> vector<8x32xf32>
    %cst_98 = arith.constant dense<0.000000e+00> : vector<8x128xf32>
    %317 = tpu.matmul %316, %5, %cst_98 {dimension_numbers = #tpu.dot_dimension_numbers<[1], [0], [0], [1], [0, 0, 1, 1], [], []>} : vector<8x32xf32>, vector<32x128xf32>, vector<8x128xf32> -> vector<8x128xf32>
    %318 = arith.addf %317, %13 : vector<8x128xf32>
    %319 = math.tanh %318 : vector<8x128xf32>
    %320 = vector.extract_strided_slice %319 {offsets = [0, 0], sizes = [8, 16], strides = [1, 1]} : vector<8x128xf32> to vector<8x16xf32>
    %321 = vector.extract_strided_slice %319 {offsets = [0, 16], sizes = [8, 16], strides = [1, 1]} : vector<8x128xf32> to vector<8x16xf32>
    %322 = vector.extract_strided_slice %319 {offsets = [0, 32], sizes = [8, 16], strides = [1, 1]} : vector<8x128xf32> to vector<8x16xf32>
    %cst_99 = arith.constant 5.000000e-01 : f32
    %323 = vector.broadcast %cst_99 : f32 to vector<8x16xf32>
    %324 = arith.mulf %323, %322 : vector<8x16xf32>
    %cst_100 = arith.constant 5.000000e-01 : f32
    %325 = vector.broadcast %cst_100 : f32 to vector<8x16xf32>
    %326 = arith.addf %324, %325 : vector<8x16xf32>
    %327 = arith.subf %321, %320 : vector<8x16xf32>
    %328 = arith.mulf %326, %327 : vector<8x16xf32>
    %329 = arith.addf %320, %328 : vector<8x16xf32>
    %330 = tpu.concatenate %329, %298 in 1 : vector<8x16xf32>, vector<8x16xf32> -> vector<8x32xf32>
    %cst_101 = arith.constant dense<0.000000e+00> : vector<8x128xf32>
    %331 = tpu.matmul %330, %7, %cst_101 {dimension_numbers = #tpu.dot_dimension_numbers<[1], [0], [0], [1], [0, 0, 1, 1], [], []>} : vector<8x32xf32>, vector<32x128xf32>, vector<8x128xf32> -> vector<8x128xf32>
    %332 = arith.addf %331, %17 : vector<8x128xf32>
    %333 = math.tanh %332 : vector<8x128xf32>
    %334 = vector.extract_strided_slice %333 {offsets = [0, 0], sizes = [8, 16], strides = [1, 1]} : vector<8x128xf32> to vector<8x16xf32>
    %335 = vector.extract_strided_slice %333 {offsets = [0, 16], sizes = [8, 16], strides = [1, 1]} : vector<8x128xf32> to vector<8x16xf32>
    %336 = vector.extract_strided_slice %333 {offsets = [0, 32], sizes = [8, 16], strides = [1, 1]} : vector<8x128xf32> to vector<8x16xf32>
    %cst_102 = arith.constant 5.000000e-01 : f32
    %337 = vector.broadcast %cst_102 : f32 to vector<8x16xf32>
    %338 = arith.mulf %337, %336 : vector<8x16xf32>
    %cst_103 = arith.constant 5.000000e-01 : f32
    %339 = vector.broadcast %cst_103 : f32 to vector<8x16xf32>
    %340 = arith.addf %338, %339 : vector<8x16xf32>
    %341 = arith.subf %335, %334 : vector<8x16xf32>
    %342 = arith.mulf %340, %341 : vector<8x16xf32>
    %343 = arith.addf %334, %342 : vector<8x16xf32>
    %c7_i32 = arith.constant 7 : i32
    %c8_i32_104 = arith.constant 8 : i32
    %344 = arith.muli %c7_i32, %c8_i32_104 : i32
    %345 = tpu.assume_multiple %344, 8 : i32
    %346 = arith.index_cast %345 : i32 to index
    %c0_105 = arith.constant 0 : index
    %347 = vector.load %arg5[%346, %c0_105] : memref<64x128xf32, #tpu.memory_space<vmem>>, vector<8x128xf32>
    %cst_106 = arith.constant dense<0.000000e+00> : vector<8x128xf32>
    %348 = tpu.matmul %315, %3, %cst_106 {dimension_numbers = #tpu.dot_dimension_numbers<[1], [0], [0], [1], [0, 0, 1, 1], [], []>} : vector<8x16xf32>, vector<16x128xf32>, vector<8x128xf32> -> vector<8x128xf32>
    %349 = arith.addf %347, %348 : vector<8x128xf32>
    %350 = math.tanh %349 : vector<8x128xf32>
    %351 = vector.extract_strided_slice %350 {offsets = [0, 0], sizes = [8, 16], strides = [1, 1]} : vector<8x128xf32> to vector<8x16xf32>
    %352 = vector.extract_strided_slice %350 {offsets = [0, 16], sizes = [8, 16], strides = [1, 1]} : vector<8x128xf32> to vector<8x16xf32>
    %353 = vector.extract_strided_slice %350 {offsets = [0, 32], sizes = [8, 16], strides = [1, 1]} : vector<8x128xf32> to vector<8x16xf32>
    %cst_107 = arith.constant 5.000000e-01 : f32
    %354 = vector.broadcast %cst_107 : f32 to vector<8x16xf32>
    %355 = arith.mulf %354, %353 : vector<8x16xf32>
    %cst_108 = arith.constant 5.000000e-01 : f32
    %356 = vector.broadcast %cst_108 : f32 to vector<8x16xf32>
    %357 = arith.addf %355, %356 : vector<8x16xf32>
    %358 = arith.subf %352, %351 : vector<8x16xf32>
    %359 = arith.mulf %357, %358 : vector<8x16xf32>
    %360 = arith.addf %351, %359 : vector<8x16xf32>
    %361 = tpu.concatenate %360, %329 in 1 : vector<8x16xf32>, vector<8x16xf32> -> vector<8x32xf32>
    %cst_109 = arith.constant dense<0.000000e+00> : vector<8x128xf32>
    %362 = tpu.matmul %361, %5, %cst_109 {dimension_numbers = #tpu.dot_dimension_numbers<[1], [0], [0], [1], [0, 0, 1, 1], [], []>} : vector<8x32xf32>, vector<32x128xf32>, vector<8x128xf32> -> vector<8x128xf32>
    %363 = arith.addf %362, %13 : vector<8x128xf32>
    %364 = math.tanh %363 : vector<8x128xf32>
    %365 = vector.extract_strided_slice %364 {offsets = [0, 0], sizes = [8, 16], strides = [1, 1]} : vector<8x128xf32> to vector<8x16xf32>
    %366 = vector.extract_strided_slice %364 {offsets = [0, 16], sizes = [8, 16], strides = [1, 1]} : vector<8x128xf32> to vector<8x16xf32>
    %367 = vector.extract_strided_slice %364 {offsets = [0, 32], sizes = [8, 16], strides = [1, 1]} : vector<8x128xf32> to vector<8x16xf32>
    %cst_110 = arith.constant 5.000000e-01 : f32
    %368 = vector.broadcast %cst_110 : f32 to vector<8x16xf32>
    %369 = arith.mulf %368, %367 : vector<8x16xf32>
    %cst_111 = arith.constant 5.000000e-01 : f32
    %370 = vector.broadcast %cst_111 : f32 to vector<8x16xf32>
    %371 = arith.addf %369, %370 : vector<8x16xf32>
    %372 = arith.subf %366, %365 : vector<8x16xf32>
    %373 = arith.mulf %371, %372 : vector<8x16xf32>
    %374 = arith.addf %365, %373 : vector<8x16xf32>
    %375 = tpu.concatenate %374, %343 in 1 : vector<8x16xf32>, vector<8x16xf32> -> vector<8x32xf32>
    %cst_112 = arith.constant dense<0.000000e+00> : vector<8x128xf32>
    %376 = tpu.matmul %375, %7, %cst_112 {dimension_numbers = #tpu.dot_dimension_numbers<[1], [0], [0], [1], [0, 0, 1, 1], [], []>} : vector<8x32xf32>, vector<32x128xf32>, vector<8x128xf32> -> vector<8x128xf32>
    %377 = arith.addf %376, %17 : vector<8x128xf32>
    %378 = math.tanh %377 : vector<8x128xf32>
    %379 = vector.extract_strided_slice %378 {offsets = [0, 0], sizes = [8, 16], strides = [1, 1]} : vector<8x128xf32> to vector<8x16xf32>
    %380 = vector.extract_strided_slice %378 {offsets = [0, 16], sizes = [8, 16], strides = [1, 1]} : vector<8x128xf32> to vector<8x16xf32>
    %381 = vector.extract_strided_slice %378 {offsets = [0, 32], sizes = [8, 16], strides = [1, 1]} : vector<8x128xf32> to vector<8x16xf32>
    %cst_113 = arith.constant 5.000000e-01 : f32
    %382 = vector.broadcast %cst_113 : f32 to vector<8x16xf32>
    %383 = arith.mulf %382, %381 : vector<8x16xf32>
    %cst_114 = arith.constant 5.000000e-01 : f32
    %384 = vector.broadcast %cst_114 : f32 to vector<8x16xf32>
    %385 = arith.addf %383, %384 : vector<8x16xf32>
    %386 = arith.subf %380, %379 : vector<8x16xf32>
    %387 = arith.mulf %385, %386 : vector<8x16xf32>
    %388 = arith.addf %379, %387 : vector<8x16xf32>
    %c8_i32_115 = arith.constant 8 : i32
    %c0_116 = arith.constant 0 : index
    %c0_117 = arith.constant 0 : index
    %c0_118 = arith.constant 0 : index
    %389 = vector.load %arg4[%c0_116, %c0_117, %c0_118] : memref<3x8x16xf32, #tpu.memory_space<vmem>>, vector<1x8x16xf32>
    %390 = vector.shape_cast %389 : vector<1x8x16xf32> to vector<8x16xf32>
    %391 = vector.shape_cast %360 : vector<8x16xf32> to vector<1x8x16xf32>
    tpu.vector_store %arg4[%c0_116, %c0_117, %c0_118], %391 {strides = array<i32>} : memref<3x8x16xf32, #tpu.memory_space<vmem>>, vector<1x8x16xf32>,
    %c1_119 = arith.constant 1 : index
    %c0_120 = arith.constant 0 : index
    %c0_121 = arith.constant 0 : index
    %392 = vector.load %arg4[%c1_119, %c0_120, %c0_121] : memref<3x8x16xf32, #tpu.memory_space<vmem>>, vector<1x8x16xf32>
    %393 = vector.shape_cast %392 : vector<1x8x16xf32> to vector<8x16xf32>
    %394 = vector.shape_cast %374 : vector<8x16xf32> to vector<1x8x16xf32>
    tpu.vector_store %arg4[%c1_119, %c0_120, %c0_121], %394 {strides = array<i32>} : memref<3x8x16xf32, #tpu.memory_space<vmem>>, vector<1x8x16xf32>,
    %c2_122 = arith.constant 2 : index
    %c0_123 = arith.constant 0 : index
    %c0_124 = arith.constant 0 : index
    %395 = vector.load %arg4[%c2_122, %c0_123, %c0_124] : memref<3x8x16xf32, #tpu.memory_space<vmem>>, vector<1x8x16xf32>
    %396 = vector.shape_cast %395 : vector<1x8x16xf32> to vector<8x16xf32>
    %397 = vector.shape_cast %388 : vector<8x16xf32> to vector<1x8x16xf32>
    tpu.vector_store %arg4[%c2_122, %c0_123, %c0_124], %397 {strides = array<i32>} : memref<3x8x16xf32, #tpu.memory_space<vmem>>, vector<1x8x16xf32>,
    return
  }
}

</mosaic_0001>

<bundles_post_ra>
// kernel: tpu_custom_call.1
= control target key start
LH: loop header
LB: loop body
LE: loop exit
PB: predicated region body
PF: predicated region fallthrough
CT: control target
= control target key end

     0   :  { %9 = vsyncpa [#allocation4], 0  ;;  %s3588_s0 = inlined_call_operand.vmem [shape: f32[64,16], index: 0, kind: input, shape index: {}]   ;;  %s3589_s1 = inlined_call_operand.vmem [shape: f32[3,8,16], index: 1, kind: input, shape index: {}]   ;;  %s3590_s2 = inlined_call_operand.hbm [shape: f32[3,32,128], index: 2, kind: input, shape index: {}]   ;;  %s3591_s3 = inlined_call_operand.vmem [shape: f32[3,1,128], index: 3, kind: input, shape index: {}]   ;;  %s3592_s4 = inlined_call_operand.hbm [shape: f32[3,8,16], index: 4, kind: output, shape index: {}]  }
   0x1   :  { %10 = vsyncpa [#allocation5], 0  ;;  %s3160_s15 = smov [#allocation3]   ;;  %s3112_s19 = scalar_lea.hbm %s3590_s2, 1536 }
   0x2   :  { %s20_s16 = sshll.u32 %s3160_s15, 4  ;;  %p3113_p0 = scmp.ne.s32.totalorder %s3590_s2, %s3112_s19  ;;  %s21_s16 = int_to_ptr.vmem [resolvable:$true] %s20_s16 }
   0x3   :  { %p3116_p1 = scmp.lt.u32.totalorder %s3112_s19, %s3590_s2 }
   0x5   :  { %p3118_p2 = pnand %p3116_p1, %p3113_p0 }
   0x7   :  { %3121 = shalt.err (!%p3118_p2)
}
   0x8   :  { %s3122_s24 = scalar_lea.vmem %s21_s16, 1536  ;;  %p3127_p4 = scmp.lt.s32.totalorder %s21_s16, %s21_s16 }
   0x9   :  { %p3123_p3 = scmp.ne.s32.totalorder %s21_s16, %s3122_s24  ;;  %p3128_p5 = scmp.lt.s32.totalorder %s3122_s24, %s3122_s24 }
   0xb   :  { %p3129_p6 = por %p3128_p5, %p3127_p4 }
   0xd   :  { %p3130_p7 = pnand %p3129_p6, %p3123_p3 }
   0xf   :  { %3133 = shalt.err (!%p3130_p7)
}
  0x10   :  { %s3161_s25 = smov 128   ;;  %s3162_s26 = smov 8  }
  0x11   :  { %26 = dma.hbm_to_vmem [thread:$0]  %s3590_s2, 1536, %s21_s16, [#allocation4], %s3161_s25, %s3161_s25, %s3162_s26  }
  0x12   :  { %3156 = dma.done.wait [#allocation4], 1536  }
  0x13   :  { %3157 = vsyncadd [#allocation4], 4294965760  ;;  %v3163_v0 = vmov 0.0|0.0   ;;  %vm3164_vm0 = vmmov 0   ;;  %v3165_v1 = vmov 0.0   ;;  %vm77_vm1 = vcmask 130048  }
  0x14   :  { %2935 = vmatprep.subr.bf16.mxu1 %v3163_v0  ;;  %2703 = vmatprep.mubr.msk.f32.mxu1 %vm3164_vm0, %v3165_v1  ;;  %v32_v2 = vld [vmem:[#allocation3] sm:$0xff]  ;;  %v33_v3 = vld [vmem:[#allocation3 + $0x8] sm:$0xff]  ;;  %v34_v6 = vld [vmem:[#allocation3 + $0x10] sm:$0xff]  ;;  %s3166_s10 = smov 16   ;;  %s3167_s11 = smov 96   ;;  %vm318_vm2 = vcmask 261120  }
  0x15   :  { %v63_v4 = vld [vmem:[%s3588_s0] sm:$0xff]  ;;  %v2931_v5 = vpack.c.bf16 %v33_v3, %v32_v2  ;;  %v35_v7 = vld [vmem:[#allocation3 + $0x18] sm:$0xff]  ;;  %v64_v9 = vld [vmem:[%s3588_s0 + $0x8] sm:$0xff] }
  0x16   :  { %2687 = vmatprep.mubr.msk.f32.mxu0 %vm77_vm1, %v63_v4  ;;  %v3216_v8 = vpack.c.bf16 %v35_v7, %v34_v6  ;;  %v215_v10 = vld [vmem:[%s3589_s1] sm:$0xff]  ;;  %v37_v19 = vld [vmem:[#allocation3 + $0x20] sm:$0xff]  ;;  %v39_v24 = vld [vmem:[#allocation3 + $0x30] sm:$0xff] }
  0x17   :  { %2932 = vmatprep.subr.bf16.mxu0 %v2931_v5  ;;  %v3234_v11 = vld [vmem:[%s3591_s3] ss:$0 sm:$0xff]  ;;  %v40_v25 = vld [vmem:[#allocation3 + $0x38] sm:$0xff]  ;;  %v2543_v31 = vld [vmem:[%s3589_s1 + $0x8] sm:$0xff] }
  0x18   :  { %2934 = vmatpush3.bf16.msra.mxu0 %v2931_v5  ;;  %2937 = vmatpush3.bf16.msra.mxu1 %v3216_v8  ;;  %v38_v20 = vld [vmem:[#allocation3 + $0x28] sm:$0xff]  ;;  %v3243_v26 = vpack.c.bf16 %v40_v25, %v39_v24  ;;  %v42_v46 = vld [vmem:[#allocation3 + $0x40] sm:$0xff]  ;;  %v65_v48 = vld [vmem:[%s3588_s0 + $0x10] sm:$0xff] }
  0x19   :  { %2938 = vmatprep.subr.bf16.mxu1 %v3163_v0  ;;  %2944 = vmatprep.subr.bf16.mxu0 %v3163_v0  ;;  %v3238_v21 = vpack.c.bf16 %v38_v20, %v37_v19  ;;  %v3268_v36 = vld [vmem:[%s3591_s3 + $0x1] ss:$0 sm:$0xff]  ;;  %v66_v50 = vld [vmem:[%s3588_s0 + $0x18] sm:$0xff]  ;;  %v44_v52 = vld [vmem:[#allocation3 + $0x50] sm:$0xff] }
  0x1a   :  { %v43_v47 = vld [vmem:[#allocation3 + $0x48] sm:$0xff]  ;;  %v45_v53 = vld [vmem:[#allocation3 + $0x58] sm:$0xff]  ;;  %v68_v54 = vld [vmem:[%s3588_s0 + $0x28] sm:$0xff] }
  0x1b   :  { %2688 = vmatmul.mubr.msk.f32.vlgmr.msra.gmra.mrb[0].mxu0 %vm77_vm1, %v64_v9  ;;  %2704 = vmatmul.mubr.msk.f32.vlgmr.msra.gmra.mrb[0].mxu1 %vm77_vm1, %v215_v10  ;;  %v3277_v49 = vpack.c.bf16 %v43_v47, %v42_v46  ;;  %v67_v51 = vld [vmem:[%s3588_s0 + $0x20] sm:$0xff]  ;;  %v3292_v55 = vpack.c.bf16 %v45_v53, %v44_v52  ;;  %v69_v58 = vld [vmem:[%s3588_s0 + $0x30] sm:$0xff]  ;;  %v70_v59 = vld [vmem:[%s3588_s0 + $0x38] sm:$0xff] }
  0x1c   :  { %2714 = vmatprep.mubr.msk.f32.mxu1 %vm3164_vm0, %v3165_v1  ;;  %2940 = vmatpush3.bf16.msra.mxu1 %v3238_v21  ;;  %v2544_v62 = vld [vmem:[%s3589_s1 + $0x10] sm:$0xff] }
  0x1d   :  { %2941 = vmatprep.subr.bf16.mxu1 %v3163_v0  ;;  %2690 = vmatprep.mubr.msk.f32.mxu0 %vm77_vm1, %v65_v48 }
  0x1e   :  { %2946 = vmatpush3.bf16.msra.mxu0 %v3277_v49 }
  0x1f   :  { %2691 = vmatmul.mubr.msk.f32.gmra.mrb[2].mxu0 %vm77_vm1, %v66_v50  ;;  %2947 = vmatprep.subr.bf16.mxu0 %v3163_v0 }
  0x20   :  { %2943 = vmatpush3.bf16.msra.mxu1 %v3243_v26  ;;  %2693 = vmatprep.mubr.msk.f32.mxu0 %vm77_vm1, %v67_v51 }
  0x21   :  { %2950 = vmatprep.subr.bf16.mxu1 %v3163_v0 }
  0x22   :  { %2949 = vmatpush3.bf16.msra.mxu0 %v3292_v55 }
  0x23   :  { %2694 = vmatmul.mubr.msk.f32.gmra.mrb[4].mxu0 %vm77_vm1, %v68_v54  ;;  %2959 = vmatprep.subr.bf16.mxu0 %v3163_v0 }
  0x24   :  { %2696 = vmatprep.mubr.msk.f32.mxu0 %vm77_vm1, %v69_v58 }
  0x27   :  { %2697 = vmatmul.mubr.msk.f32.gmra.mrb[6].mxu0 %vm77_vm1, %v70_v59 }
  0x28   :  { %2725 = vmatprep.mubr.msk.f32.mxu0 %vm3164_vm0, %v3165_v1 }
  0xee   :  { %v2689_v12 = vpop.f32.mrb[0].mxu0  ;;  %v290_v13 = vpop.f32.mrb[0].mxu1 }
  0xef   :  { %v168_v14 = vpop.f32.mrb[1].mxu0  ;;  %v2705_v15 = vpop.f32.mrb[1].mxu1  ;;  %v174_v40 = vadd.f32 %v2689_v12, %v3234_v11 }
  0xf0   :  { %v169_v16 = vadd.f32 %v3234_v11, %v168_v14 }
  0xf2   :  { %v294_v17 = vadd.f32 %v290_v13, %v169_v16  ;;  %v3316_v10 = vpop.f32.mrb[2].mxu0 }
  0xf3   :  { %v178_v12 = vpop.f32.mrb[3].mxu0 }
  0xf4   :  { %3064 = vtanh.f32 %v294_v17 }
  0xf6   :  { %v3318_v13 = vpop.f32.mrb[4].mxu0 }
  0xf7   :  { %v3320_v14 = vpop.f32.mrb[5].mxu0 }
  0xfa   :  { %v3322_v16 = vpop.f32.mrb[6].mxu0 }
  0xfe   :  { %v3065_v18 = vpop.eup %3064 }
  0xff   :  { %299 = vrot.lane.b32.xlu0 %v3065_v18, %s3166_s10  ;;  %v296_v27 = vmul.f32 0.5, %v3065_v18 }
 0x101   :  { %v297_v28 = vadd.f32 0.5, %v296_v27  ;;  %v3351_v27 = vld [vmem:[%s3591_s3 + $0x2] ss:$0 sm:$0xff]  ;;  %s3168_s3 = smov [#allocation6]  }
 0x102   :  { %s2518_s5 = sshll.u32 %s3168_s3, 4  ;;  %s2519_s5 = int_to_ptr.vmem [resolvable:$true] %s2518_s5 }
 0x103   :  { %s3134_s6 = scalar_lea.vmem %s2519_s5, 384  ;;  %p3139_p9 = scmp.lt.s32.totalorder %s2519_s5, %s2519_s5 }
 0x104   :  { %p3135_p8 = scmp.ne.s32.totalorder %s2519_s5, %s3134_s6  ;;  %p3140_p10 = scmp.lt.s32.totalorder %s3134_s6, %s3134_s6 }
 0x106   :  { %p3141_p11 = por %p3140_p10, %p3139_p9 }
 0x108   :  { %p3142_p12 = pnand %p3141_p11, %p3135_p8 }
 0x171   :  { %v300_v22 = vpop.permute.xlu0 %299 }
 0x172   :  { %v302_v23 = vsub.f32 %v3065_v18, %v300_v22 }
 0x174   :  { %304 = vrot.lane.b32.xlu0 %v302_v23, %s3166_s10 }
 0x1e6   :  { %v305_v29 = vpop.permute.xlu0 %304 }
 0x1e7   :  { %v307_v30 = vmul.f32 %v305_v29, %v297_v28 }
 0x1e9   :  { %309 = vrot.lane.b32.xlu1 %v307_v30, %s3167_s11 }
 0x1ed   :  { %314 = vrot.lane.b32.xlu1 %v2543_v31, %s3166_s10 }
 0x25b   :  { %v310_v32 = vpop.permute.xlu1 %309 }
 0x25c   :  { %v312_v33 = vadd.f32 %v3065_v18, %v310_v32  ;;  %v3324_v18 = vpop.f32.mrb[7].mxu0 }
 0x25f   :  { %v315_v34 = vpop.permute.xlu1 %314 }
 0x260   :  { %v317_v35 = vsel %vm77_vm1, %v312_v33, %v315_v34 }
 0x261   :  { %2715 = vmatmul.mubr.msk.f32.vlgmr.msra.gmra.mrb[2].mxu1 %vm318_vm2, %v317_v35  ;;  %v179_v35 = vadd.f32 %v3234_v11, %v178_v12 }
 0x262   :  { %2952 = vmatpush3.bf16.msra.mxu1 %v3216_v8  ;;  %2732 = vmatprep.mubr.msk.f32.mxu1 %vm3164_vm0, %v3165_v1 }
 0x263   :  { %2953 = vmatprep.subr.bf16.mxu1 %v3163_v0 }
 0x265   :  { %2733 = vmatmul.mubr.msk.f32.vlgmr.msra.gmra.mrb[4].mxu1 %vm77_vm1, %v312_v33 }
 0x266   :  { %2955 = vmatpush3.bf16.msra.mxu1 %v3238_v21  ;;  %2743 = vmatprep.mubr.msk.f32.mxu1 %vm3164_vm0, %v3165_v1 }
 0x267   :  { %2956 = vmatprep.subr.bf16.mxu1 %v3163_v0 }
 0x26a   :  { %2958 = vmatpush3.bf16.msra.mxu1 %v3243_v26 }
 0x26b   :  { %2965 = vmatprep.subr.bf16.mxu1 %v3163_v0 }
 0x334   :  { %v388_v37 = vpop.f32.mrb[2].mxu1 }
 0x335   :  { %v389_v38 = vadd.f32 %v3268_v36, %v388_v37  ;;  %v2716_v39 = vpop.f32.mrb[3].mxu1 }
 0x337   :  { %3066 = vtanh.f32 %v389_v38 }
 0x338   :  { %v577_v41 = vpop.f32.mrb[4].mxu1 }
 0x339   :  { %v581_v42 = vadd.f32 %v577_v41, %v174_v40  ;;  %v2734_v43 = vpop.f32.mrb[5].mxu1 }
 0x33b   :  { %3068 = vtanh.f32 %v581_v42 }
 0x341   :  { %v3067_v44 = vpop.eup %3066 }
 0x342   :  { %396 = vrot.lane.b32.xlu0 %v3067_v44, %s3166_s10  ;;  %v393_v63 = vmul.f32 0.5, %v3067_v44 }
 0x344   :  { %v394_v2 = vadd.f32 0.5, %v393_v63 }
 0x345   :  { %v3069_v45 = vpop.eup %3068 }
 0x346   :  { %586 = vrot.lane.b32.xlu1 %v3069_v45, %s3166_s10  ;;  %v583_v3 = vmul.f32 0.5, %v3069_v45 }
 0x348   :  { %v584_v6 = vadd.f32 0.5, %v583_v3 }
 0x3b4   :  { %v397_v56 = vpop.permute.xlu0 %396 }
 0x3b5   :  { %v399_v57 = vsub.f32 %v3067_v44, %v397_v56 }
 0x3b7   :  { %401 = vrot.lane.b32.xlu0 %v399_v57, %s3166_s10 }
 0x3b8   :  { %v587_v60 = vpop.permute.xlu1 %586 }
 0x3b9   :  { %v589_v61 = vsub.f32 %v3069_v45, %v587_v60 }
 0x3bb   :  { %591 = vrot.lane.b32.xlu1 %v589_v61, %s3166_s10 }
 0x3bf   :  { %411 = vrot.lane.b32.xlu1 %v2544_v62, %s3166_s10 }
 0x429   :  { %v402_v4 = vpop.permute.xlu0 %401 }
 0x42a   :  { %v404_v5 = vmul.f32 %v402_v4, %v394_v2 }
 0x42c   :  { %406 = vrot.lane.b32.xlu0 %v404_v5, %s3167_s11 }
 0x42d   :  { %v592_v7 = vpop.permute.xlu1 %591 }
 0x42e   :  { %v594_v9 = vmul.f32 %v592_v7, %v584_v6 }
 0x430   :  { %596 = vrot.lane.b32.xlu0 %v594_v9, %s3167_s11 }
 0x431   :  { %v412_v15 = vpop.permute.xlu1 %411 }
 0x49e   :  { %v407_v17 = vpop.permute.xlu0 %406 }
 0x49f   :  { %v409_v19 = vadd.f32 %v3067_v44, %v407_v17 }
 0x4a1   :  { %v414_v20 = vsel %vm77_vm1, %v409_v19, %v412_v15  ;;  %601 = vrot.lane.b32.xlu1 %v409_v19, %s3166_s10 }
 0x4a2   :  { %2726 = vmatmul.mubr.msk.f32.vlgmr.msra.gmra.mrb[8].mxu0 %vm318_vm2, %v414_v20  ;;  %v597_v22 = vpop.permute.xlu0 %596 }
 0x4a3   :  { %2961 = vmatpush3.bf16.msra.mxu0 %v3277_v49  ;;  %2754 = vmatprep.mubr.msk.f32.mxu0 %vm3164_vm0, %v3165_v1  ;;  %v599_v23 = vadd.f32 %v3069_v45, %v597_v22 }
 0x4a4   :  { %2962 = vmatprep.subr.bf16.mxu0 %v3163_v0 }
 0x4a7   :  { %2964 = vmatpush3.bf16.msra.mxu0 %v3292_v55 }
 0x4a8   :  { %2968 = vmatprep.subr.bf16.mxu0 %v3163_v0 }
 0x513   :  { %v602_v24 = vpop.permute.xlu1 %601 }
 0x514   :  { %v604_v25 = vsel %vm77_vm1, %v599_v23, %v602_v24 }
 0x515   :  { %2744 = vmatmul.mubr.msk.f32.vlgmr.msra.gmra.mrb[6].mxu1 %vm318_vm2, %v604_v25  ;;  %v184_v25 = vadd.f32 %v3316_v10, %v3234_v11 }
 0x516   :  { %2967 = vmatpush3.bf16.msra.mxu1 %v3216_v8  ;;  %2761 = vmatprep.mubr.msk.f32.mxu1 %vm3164_vm0, %v3165_v1 }
 0x517   :  { %2974 = vmatprep.subr.bf16.mxu1 %v3163_v0 }
 0x519   :  { %2762 = vmatmul.mubr.msk.f32.vlgmr.msra.gmra.mrb[8].mxu1 %vm77_vm1, %v599_v23 }
 0x51a   :  { %2976 = vmatpush3.bf16.msra.mxu1 %v3277_v49  ;;  %2783 = vmatprep.mubr.msk.f32.mxu1 %vm3164_vm0, %v3165_v1 }
 0x51b   :  { %2977 = vmatprep.subr.bf16.mxu1 %v3163_v0 }
 0x51e   :  { %2979 = vmatpush3.bf16.msra.mxu1 %v3292_v55 }
 0x51f   :  { %2983 = vmatprep.subr.bf16.mxu1 %v3163_v0 }
 0x575   :  { %v484_v28 = vpop.f32.mrb[8].mxu0 }
 0x576   :  { %v485_v29 = vadd.f32 %v3351_v27, %v484_v28  ;;  %v2727_v30 = vpop.f32.mrb[9].mxu0 }
 0x578   :  { %3070 = vtanh.f32 %v485_v29 }
 0x582   :  { %v3071_v31 = vpop.eup %3070 }
 0x583   :  { %492 = vrot.lane.b32.xlu0 %v3071_v31, %s3166_s10  ;;  %v489_v44 = vmul.f32 0.5, %v3071_v31 }
 0x585   :  { %v490_v47 = vadd.f32 0.5, %v489_v44 }
 0x5e8   :  { %v674_v32 = vpop.f32.mrb[6].mxu1 }
 0x5e9   :  { %v675_v33 = vadd.f32 %v3268_v36, %v674_v32  ;;  %v2745_v34 = vpop.f32.mrb[7].mxu1 }
 0x5eb   :  { %3072 = vtanh.f32 %v675_v33 }
 0x5ec   :  { %v863_v37 = vpop.f32.mrb[8].mxu1 }
 0x5ed   :  { %v867_v38 = vadd.f32 %v863_v37, %v179_v35  ;;  %v2763_v39 = vpop.f32.mrb[9].mxu1 }
 0x5ef   :  { %3074 = vtanh.f32 %v867_v38 }
 0x5f5   :  { %v3073_v40 = vpop.eup %3072  ;;  %v493_v41 = vpop.permute.xlu0 %492 }
 0x5f6   :  { %v495_v42 = vsub.f32 %v3071_v31, %v493_v41  ;;  %682 = vrot.lane.b32.xlu1 %v3073_v40, %s3166_s10  ;;  %v679_v53 = vmul.f32 0.5, %v3073_v40 }
 0x5f8   :  { %497 = vrot.lane.b32.xlu0 %v495_v42, %s3166_s10  ;;  %v680_v54 = vadd.f32 0.5, %v679_v53 }
 0x5f9   :  { %v3075_v43 = vpop.eup %3074 }
 0x5fa   :  { %872 = vrot.lane.b32.xlu1 %v3075_v43, %s3166_s10  ;;  %v869_v56 = vmul.f32 0.5, %v3075_v43 }
 0x5fc   :  { %v870_v61 = vadd.f32 0.5, %v869_v56 }
 0x668   :  { %v683_v45 = vpop.permute.xlu1 %682 }
 0x669   :  { %v685_v46 = vsub.f32 %v3073_v40, %v683_v45 }
 0x66a   :  { %v498_v48 = vpop.permute.xlu0 %497 }
 0x66b   :  { %v500_v50 = vmul.f32 %v498_v48, %v490_v47  ;;  %687 = vrot.lane.b32.xlu0 %v685_v46, %s3166_s10 }
 0x66c   :  { %v873_v51 = vpop.permute.xlu1 %872 }
 0x66d   :  { %v875_v52 = vsub.f32 %v3075_v43, %v873_v51  ;;  %502 = vrot.lane.b32.xlu1 %v500_v50, %s3167_s11 }
 0x66f   :  { %877 = vrot.lane.b32.xlu0 %v875_v52, %s3166_s10 }
 0x6dd   :  { %v688_v57 = vpop.permute.xlu0 %687 }
 0x6de   :  { %v690_v58 = vmul.f32 %v688_v57, %v680_v54 }
 0x6df   :  { %v503_v59 = vpop.permute.xlu1 %502 }
 0x6e0   :  { %v505_v60 = vadd.f32 %v3071_v31, %v503_v59  ;;  %692 = vrot.lane.b32.xlu1 %v690_v58, %s3167_s11 }
 0x6e1   :  { %v878_v62 = vpop.permute.xlu0 %877 }
 0x6e2   :  { %v880_v63 = vmul.f32 %v878_v62, %v870_v61  ;;  %697 = vrot.lane.b32.xlu0 %v505_v60, %s3166_s10 }
 0x6e4   :  { %882 = vrot.lane.b32.xlu1 %v880_v63, %s3167_s11 }
 0x752   :  { %v693_v2 = vpop.permute.xlu1 %692 }
 0x753   :  { %v695_v3 = vadd.f32 %v3073_v40, %v693_v2 }
 0x754   :  { %v698_v4 = vpop.permute.xlu0 %697 }
 0x755   :  { %v700_v5 = vsel %vm77_vm1, %v695_v3, %v698_v4  ;;  %887 = vrot.lane.b32.xlu0 %v695_v3, %s3166_s10 }
 0x756   :  { %2755 = vmatmul.mubr.msk.f32.vlgmr.msra.gmra.mrb[10].mxu0 %vm318_vm2, %v700_v5  ;;  %v883_v6 = vpop.permute.xlu1 %882 }
 0x757   :  { %2970 = vmatpush3.bf16.msra.mxu0 %v3238_v21  ;;  %2772 = vmatprep.mubr.msk.f32.mxu0 %vm3164_vm0, %v3165_v1  ;;  %v885_v7 = vadd.f32 %v3075_v43, %v883_v6 }
 0x758   :  { %2971 = vmatprep.subr.bf16.mxu0 %v3163_v0 }
 0x75b   :  { %2973 = vmatpush3.bf16.msra.mxu0 %v3243_v26 }
 0x75c   :  { %2980 = vmatprep.subr.bf16.mxu0 %v3163_v0 }
 0x7c7   :  { %v888_v9 = vpop.permute.xlu0 %887 }
 0x7c8   :  { %v890_v12 = vsel %vm77_vm1, %v885_v7, %v888_v9  ;;  %v189_v9 = vadd.f32 %v3234_v11, %v3320_v14 }
 0x7c9   :  { %2773 = vmatmul.mubr.msk.f32.vlgmr.msra.gmra.mrb[12].mxu0 %vm318_vm2, %v890_v12 }
 0x7ca   :  { %2982 = vmatpush3.bf16.msra.mxu0 %v3216_v8  ;;  %2790 = vmatprep.mubr.msk.f32.mxu0 %vm3164_vm0, %v3165_v1 }
 0x7cb   :  { %2989 = vmatprep.subr.bf16.mxu0 %v3163_v0 }
 0x7cd   :  { %2791 = vmatmul.mubr.msk.f32.vlgmr.msra.gmra.mrb[14].mxu0 %vm77_vm1, %v885_v7 }
 0x7ce   :  { %2991 = vmatpush3.bf16.msra.mxu0 %v3277_v49  ;;  %2812 = vmatprep.mubr.msk.f32.mxu0 %vm3164_vm0, %v3165_v1 }
 0x7cf   :  { %2992 = vmatprep.subr.bf16.mxu0 %v3163_v0 }
 0x7d2   :  { %2994 = vmatpush3.bf16.msra.mxu0 %v3292_v55 }
 0x7d3   :  { %2998 = vmatprep.subr.bf16.mxu0 %v3163_v0 }
 0x829   :  { %v770_v15 = vpop.f32.mrb[10].mxu0 }
 0x82a   :  { %v771_v17 = vadd.f32 %v3351_v27, %v770_v15  ;;  %v2756_v19 = vpop.f32.mrb[11].mxu0 }
 0x82c   :  { %3076 = vtanh.f32 %v771_v17 }
 0x836   :  { %v3077_v20 = vpop.eup %3076 }
 0x837   :  { %778 = vrot.lane.b32.xlu1 %v3077_v20, %s3166_s10  ;;  %v775_v35 = vmul.f32 0.5, %v3077_v20 }
 0x839   :  { %v776_v39 = vadd.f32 0.5, %v775_v35 }
 0x89c   :  { %v960_v22 = vpop.f32.mrb[12].mxu0 }
 0x89d   :  { %v961_v23 = vadd.f32 %v3268_v36, %v960_v22  ;;  %v2774_v24 = vpop.f32.mrb[13].mxu0 }
 0x89f   :  { %3078 = vtanh.f32 %v961_v23 }
 0x8a0   :  { %v1149_v28 = vpop.f32.mrb[14].mxu0 }
 0x8a1   :  { %v1153_v29 = vadd.f32 %v1149_v28, %v184_v25  ;;  %v2792_v30 = vpop.f32.mrb[15].mxu0 }
 0x8a3   :  { %3080 = vtanh.f32 %v1153_v29 }
 0x8a9   :  { %v3079_v31 = vpop.eup %3078  ;;  %v779_v32 = vpop.permute.xlu1 %778 }
 0x8aa   :  { %v781_v33 = vsub.f32 %v3077_v20, %v779_v32  ;;  %968 = vrot.lane.b32.xlu0 %v3079_v31, %s3166_s10  ;;  %v965_v43 = vmul.f32 0.5, %v3079_v31 }
 0x8ac   :  { %783 = vrot.lane.b32.xlu1 %v781_v33, %s3166_s10  ;;  %v966_v44 = vadd.f32 0.5, %v965_v43 }
 0x8ad   :  { %v3081_v34 = vpop.eup %3080 }
 0x8ae   :  { %1158 = vrot.lane.b32.xlu0 %v3081_v34, %s3166_s10  ;;  %v1155_v45 = vmul.f32 0.5, %v3081_v34 }
 0x8b0   :  { %v1156_v51 = vadd.f32 0.5, %v1155_v45 }
 0x91c   :  { %v969_v37 = vpop.permute.xlu0 %968 }
 0x91d   :  { %v971_v38 = vsub.f32 %v3079_v31, %v969_v37 }
 0x91e   :  { %v784_v10 = vpop.permute.xlu1 %783 }
 0x91f   :  { %v786_v40 = vmul.f32 %v784_v10, %v776_v39  ;;  %973 = vrot.lane.b32.xlu1 %v971_v38, %s3166_s10 }
 0x920   :  { %v1159_v41 = vpop.permute.xlu0 %1158 }
 0x921   :  { %v1161_v42 = vsub.f32 %v3081_v34, %v1159_v41  ;;  %788 = vrot.lane.b32.xlu0 %v786_v40, %s3167_s11 }
 0x923   :  { %1163 = vrot.lane.b32.xlu1 %v1161_v42, %s3166_s10 }
 0x991   :  { %v974_v46 = vpop.permute.xlu1 %973 }
 0x992   :  { %v976_v47 = vmul.f32 %v974_v46, %v966_v44 }
 0x993   :  { %v789_v48 = vpop.permute.xlu0 %788 }
 0x994   :  { %v791_v50 = vadd.f32 %v3077_v20, %v789_v48  ;;  %978 = vrot.lane.b32.xlu0 %v976_v47, %s3167_s11 }
 0x995   :  { %v1164_v52 = vpop.permute.xlu1 %1163 }
 0x996   :  { %v1166_v53 = vmul.f32 %v1164_v52, %v1156_v51  ;;  %983 = vrot.lane.b32.xlu1 %v791_v50, %s3166_s10 }
 0x998   :  { %1168 = vrot.lane.b32.xlu0 %v1166_v53, %s3167_s11 }
 0xa06   :  { %v979_v54 = vpop.permute.xlu0 %978 }
 0xa07   :  { %v981_v56 = vadd.f32 %v3079_v31, %v979_v54 }
 0xa08   :  { %v984_v57 = vpop.permute.xlu1 %983 }
 0xa09   :  { %v986_v58 = vsel %vm77_vm1, %v981_v56, %v984_v57  ;;  %1173 = vrot.lane.b32.xlu1 %v981_v56, %s3166_s10 }
 0xa0a   :  { %2784 = vmatmul.mubr.msk.f32.vlgmr.msra.gmra.mrb[10].mxu1 %vm318_vm2, %v986_v58  ;;  %v1169_v59 = vpop.permute.xlu0 %1168 }
 0xa0b   :  { %2985 = vmatpush3.bf16.msra.mxu1 %v3238_v21  ;;  %2801 = vmatprep.mubr.msk.f32.mxu1 %vm3164_vm0, %v3165_v1  ;;  %v1171_v60 = vadd.f32 %v3081_v34, %v1169_v59 }
 0xa0c   :  { %2986 = vmatprep.subr.bf16.mxu1 %v3163_v0 }
 0xa0f   :  { %2988 = vmatpush3.bf16.msra.mxu1 %v3243_v26 }
 0xa10   :  { %2995 = vmatprep.subr.bf16.mxu1 %v3163_v0 }
 0xa7b   :  { %v1174_v61 = vpop.permute.xlu1 %1173 }
 0xa7c   :  { %v1176_v62 = vsel %vm77_vm1, %v1171_v60, %v1174_v61 }
 0xa7d   :  { %2802 = vmatmul.mubr.msk.f32.vlgmr.msra.gmra.mrb[12].mxu1 %vm318_vm2, %v1176_v62 }
 0xa7e   :  { %2997 = vmatpush3.bf16.msra.mxu1 %v3216_v8  ;;  %2819 = vmatprep.mubr.msk.f32.mxu1 %vm3164_vm0, %v3165_v1 }
 0xa7f   :  { %3004 = vmatprep.subr.bf16.mxu1 %v3163_v0 }
 0xa81   :  { %2820 = vmatmul.mubr.msk.f32.vlgmr.msra.gmra.mrb[14].mxu1 %vm77_vm1, %v1171_v60  ;;  %v194_v60 = vadd.f32 %v3318_v13, %v3234_v11 }
 0xa82   :  { %3006 = vmatpush3.bf16.msra.mxu1 %v3277_v49  ;;  %2841 = vmatprep.mubr.msk.f32.mxu1 %vm3164_vm0, %v3165_v1 }
 0xa83   :  { %3007 = vmatprep.subr.bf16.mxu1 %v3163_v0 }
 0xa86   :  { %3009 = vmatpush3.bf16.msra.mxu1 %v3292_v55 }
 0xa87   :  { %3013 = vmatprep.subr.bf16.mxu1 %v3163_v0 }
 0xadd   :  { %v1056_v63 = vpop.f32.mrb[10].mxu1 }
 0xade   :  { %v1057_v2 = vadd.f32 %v3351_v27, %v1056_v63  ;;  %v2785_v3 = vpop.f32.mrb[11].mxu1 }
 0xae0   :  { %3082 = vtanh.f32 %v1057_v2 }
 0xaea   :  { %v3083_v4 = vpop.eup %3082 }
 0xaeb   :  { %1064 = vrot.lane.b32.xlu0 %v3083_v4, %s3166_s10  ;;  %v1061_v24 = vmul.f32 0.5, %v3083_v4 }
 0xaed   :  { %v1062_v29 = vadd.f32 0.5, %v1061_v24 }
 0xb50   :  { %v1246_v5 = vpop.f32.mrb[12].mxu1 }
 0xb51   :  { %v1247_v6 = vadd.f32 %v3268_v36, %v1246_v5  ;;  %v2803_v7 = vpop.f32.mrb[13].mxu1 }
 0xb53   :  { %3084 = vtanh.f32 %v1247_v6 }
 0xb54   :  { %v1435_v12 = vpop.f32.mrb[14].mxu1 }
 0xb55   :  { %v1439_v15 = vadd.f32 %v1435_v12, %v189_v9  ;;  %v2821_v17 = vpop.f32.mrb[15].mxu1 }
 0xb57   :  { %3086 = vtanh.f32 %v1439_v15 }
 0xb5d   :  { %v3085_v19 = vpop.eup %3084  ;;  %v1065_v20 = vpop.permute.xlu0 %1064 }
 0xb5e   :  { %v1067_v22 = vsub.f32 %v3083_v4, %v1065_v20  ;;  %1254 = vrot.lane.b32.xlu1 %v3085_v19, %s3166_s10  ;;  %v1251_v33 = vmul.f32 0.5, %v3085_v19 }
 0xb60   :  { %1069 = vrot.lane.b32.xlu0 %v1067_v22, %s3166_s10  ;;  %v1252_v34 = vadd.f32 0.5, %v1251_v33 }
 0xb61   :  { %v3087_v23 = vpop.eup %3086 }
 0xb62   :  { %1444 = vrot.lane.b32.xlu1 %v3087_v23, %s3166_s10  ;;  %v1441_v35 = vmul.f32 0.5, %v3087_v23 }
 0xb64   :  { %v1442_v40 = vadd.f32 0.5, %v1441_v35 }
 0xbd0   :  { %v1255_v25 = vpop.permute.xlu1 %1254 }
 0xbd1   :  { %v1257_v28 = vsub.f32 %v3085_v19, %v1255_v25 }
 0xbd2   :  { %v1070_v14 = vpop.permute.xlu0 %1069 }
 0xbd3   :  { %v1072_v30 = vmul.f32 %v1070_v14, %v1062_v29  ;;  %1259 = vrot.lane.b32.xlu0 %v1257_v28, %s3166_s10 }
 0xbd4   :  { %v1445_v31 = vpop.permute.xlu1 %1444 }
 0xbd5   :  { %v1447_v32 = vsub.f32 %v3087_v23, %v1445_v31  ;;  %1074 = vrot.lane.b32.xlu1 %v1072_v30, %s3167_s11 }
 0xbd7   :  { %1449 = vrot.lane.b32.xlu0 %v1447_v32, %s3166_s10 }
 0xc45   :  { %v1260_v37 = vpop.permute.xlu0 %1259 }
 0xc46   :  { %v1262_v38 = vmul.f32 %v1260_v37, %v1252_v34 }
 0xc47   :  { %v1075_v39 = vpop.permute.xlu1 %1074 }
 0xc48   :  { %v1077_v10 = vadd.f32 %v3083_v4, %v1075_v39  ;;  %1264 = vrot.lane.b32.xlu1 %v1262_v38, %s3167_s11 }
 0xc49   :  { %v1450_v41 = vpop.permute.xlu0 %1449 }
 0xc4a   :  { %v1452_v42 = vmul.f32 %v1450_v41, %v1442_v40  ;;  %1269 = vrot.lane.b32.xlu0 %v1077_v10, %s3166_s10 }
 0xc4c   :  { %1454 = vrot.lane.b32.xlu1 %v1452_v42, %s3167_s11 }
 0xcba   :  { %v1265_v43 = vpop.permute.xlu1 %1264 }
 0xcbb   :  { %v1267_v44 = vadd.f32 %v3085_v19, %v1265_v43 }
 0xcbc   :  { %v1270_v45 = vpop.permute.xlu0 %1269 }
 0xcbd   :  { %v1272_v46 = vsel %vm77_vm1, %v1267_v44, %v1270_v45  ;;  %1459 = vrot.lane.b32.xlu0 %v1267_v44, %s3166_s10 }
 0xcbe   :  { %2813 = vmatmul.mubr.msk.f32.vlgmr.msra.gmra.mrb[16].mxu0 %vm318_vm2, %v1272_v46  ;;  %v1455_v47 = vpop.permute.xlu1 %1454 }
 0xcbf   :  { %3000 = vmatpush3.bf16.msra.mxu0 %v3238_v21  ;;  %2830 = vmatprep.mubr.msk.f32.mxu0 %vm3164_vm0, %v3165_v1  ;;  %v1457_v48 = vadd.f32 %v3087_v23, %v1455_v47  ;;  %v199_v47 = vadd.f32 %v3234_v11, %v3324_v18 }
 0xcc0   :  { %3001 = vmatprep.subr.bf16.mxu0 %v3163_v0 }
 0xcc3   :  { %3003 = vmatpush3.bf16.msra.mxu0 %v3243_v26 }
 0xcc4   :  { %3010 = vmatprep.subr.bf16.mxu0 %v3163_v0 }
 0xd2f   :  { %v1460_v50 = vpop.permute.xlu0 %1459 }
 0xd30   :  { %v1462_v51 = vsel %vm77_vm1, %v1457_v48, %v1460_v50 }
 0xd31   :  { %2831 = vmatmul.mubr.msk.f32.vlgmr.msra.gmra.mrb[18].mxu0 %vm318_vm2, %v1462_v51 }
 0xd32   :  { %3012 = vmatpush3.bf16.msra.mxu0 %v3216_v8  ;;  %2848 = vmatprep.mubr.msk.f32.mxu0 %vm3164_vm0, %v3165_v1 }
 0xd33   :  { %3019 = vmatprep.subr.bf16.mxu0 %v3163_v0 }
 0xd35   :  { %2849 = vmatmul.mubr.msk.f32.vlgmr.msra.gmra.mrb[20].mxu0 %vm77_vm1, %v1457_v48 }
 0xd36   :  { %3021 = vmatpush3.bf16.msra.mxu0 %v3277_v49  ;;  %2870 = vmatprep.mubr.msk.f32.mxu0 %vm3164_vm0, %v3165_v1 }
 0xd37   :  { %3022 = vmatprep.subr.bf16.mxu0 %v3163_v0 }
 0xd3a   :  { %3024 = vmatpush3.bf16.msra.mxu0 %v3292_v55 }
 0xd3b   :  { %3028 = vmatprep.subr.bf16.mxu0 %v3163_v0 }
 0xd91   :  { %v1342_v52 = vpop.f32.mrb[16].mxu0 }
 0xd92   :  { %v1343_v53 = vadd.f32 %v3351_v27, %v1342_v52  ;;  %v2814_v54 = vpop.f32.mrb[17].mxu0 }
 0xd94   :  { %3088 = vtanh.f32 %v1343_v53 }
 0xd9e   :  { %v3089_v56 = vpop.eup %3088 }
 0xd9f   :  { %1350 = vrot.lane.b32.xlu1 %v3089_v56, %s3166_s10  ;;  %v1347_v6 = vmul.f32 0.5, %v3089_v56 }
 0xda1   :  { %v1348_v12 = vadd.f32 0.5, %v1347_v6 }
 0xe04   :  { %v1532_v57 = vpop.f32.mrb[18].mxu0 }
 0xe05   :  { %v1533_v58 = vadd.f32 %v3268_v36, %v1532_v57  ;;  %v2832_v59 = vpop.f32.mrb[19].mxu0 }
 0xe07   :  { %3090 = vtanh.f32 %v1533_v58 }
 0xe08   :  { %v1721_v61 = vpop.f32.mrb[20].mxu0 }
 0xe09   :  { %v1725_v62 = vadd.f32 %v1721_v61, %v194_v60  ;;  %v2850_v63 = vpop.f32.mrb[21].mxu0 }
 0xe0b   :  { %3092 = vtanh.f32 %v1725_v62 }
 0xe11   :  { %v3091_v2 = vpop.eup %3090  ;;  %v1351_v3 = vpop.permute.xlu1 %1350 }
 0xe12   :  { %v1353_v4 = vsub.f32 %v3089_v56, %v1351_v3  ;;  %1540 = vrot.lane.b32.xlu0 %v3091_v2, %s3166_s10  ;;  %v1537_v20 = vmul.f32 0.5, %v3091_v2 }
 0xe14   :  { %1355 = vrot.lane.b32.xlu1 %v1353_v4, %s3166_s10  ;;  %v1538_v22 = vadd.f32 0.5, %v1537_v20 }
 0xe15   :  { %v3093_v5 = vpop.eup %3092 }
 0xe16   :  { %1730 = vrot.lane.b32.xlu0 %v3093_v5, %s3166_s10  ;;  %v1727_v23 = vmul.f32 0.5, %v3093_v5 }
 0xe18   :  { %v1728_v14 = vadd.f32 0.5, %v1727_v23 }
 0xe84   :  { %v1541_v7 = vpop.permute.xlu0 %1540 }
 0xe85   :  { %v1543_v9 = vsub.f32 %v3091_v2, %v1541_v7 }
 0xe86   :  { %v1356_v13 = vpop.permute.xlu1 %1355 }
 0xe87   :  { %v1358_v15 = vmul.f32 %v1356_v13, %v1348_v12  ;;  %1545 = vrot.lane.b32.xlu1 %v1543_v9, %s3166_s10 }
 0xe88   :  { %v1731_v17 = vpop.permute.xlu0 %1730 }
 0xe89   :  { %v1733_v19 = vsub.f32 %v3093_v5, %v1731_v17  ;;  %1360 = vrot.lane.b32.xlu0 %v1358_v15, %s3167_s11 }
 0xe8b   :  { %1735 = vrot.lane.b32.xlu1 %v1733_v19, %s3166_s10 }
 0xef9   :  { %v1546_v24 = vpop.permute.xlu1 %1545 }
 0xefa   :  { %v1548_v25 = vmul.f32 %v1546_v24, %v1538_v22 }
 0xefb   :  { %v1361_v28 = vpop.permute.xlu0 %1360 }
 0xefc   :  { %v1363_v29 = vadd.f32 %v3089_v56, %v1361_v28  ;;  %1550 = vrot.lane.b32.xlu0 %v1548_v25, %s3167_s11 }
 0xefd   :  { %v1736_v30 = vpop.permute.xlu1 %1735 }
 0xefe   :  { %v1738_v31 = vmul.f32 %v1736_v30, %v1728_v14  ;;  %1555 = vrot.lane.b32.xlu1 %v1363_v29, %s3166_s10 }
 0xf00   :  { %1740 = vrot.lane.b32.xlu0 %v1738_v31, %s3167_s11 }
 0xf6e   :  { %v1551_v32 = vpop.permute.xlu0 %1550 }
 0xf6f   :  { %v1553_v33 = vadd.f32 %v3091_v2, %v1551_v32 }
 0xf70   :  { %v1556_v34 = vpop.permute.xlu1 %1555 }
 0xf71   :  { %v1558_v35 = vsel %vm77_vm1, %v1553_v33, %v1556_v34  ;;  %1745 = vrot.lane.b32.xlu1 %v1553_v33, %s3166_s10 }
 0xf72   :  { %2842 = vmatmul.mubr.msk.f32.vlgmr.msra.gmra.mrb[16].mxu1 %vm318_vm2, %v1558_v35  ;;  %v1741_v37 = vpop.permute.xlu0 %1740 }
 0xf73   :  { %3015 = vmatpush3.bf16.msra.mxu1 %v3238_v21  ;;  %2859 = vmatprep.mubr.msk.f32.mxu1 %vm3164_vm0, %v3165_v1  ;;  %v1743_v38 = vadd.f32 %v3093_v5, %v1741_v37 }
 0xf74   :  { %3016 = vmatprep.subr.bf16.mxu1 %v3163_v0 }
 0xf77   :  { %3018 = vmatpush3.bf16.msra.mxu1 %v3243_v26 }
 0xf78   :  { %3025 = vmatprep.subr.bf16.mxu1 %v3163_v0 }
 0xfe3   :  { %v1746_v39 = vpop.permute.xlu1 %1745 }
 0xfe4   :  { %v1748_v10 = vsel %vm77_vm1, %v1743_v38, %v1746_v39 }
 0xfe5   :  { %2860 = vmatmul.mubr.msk.f32.vlgmr.msra.gmra.mrb[18].mxu1 %vm318_vm2, %v1748_v10 }
 0xfe6   :  { %3027 = vmatpush3.bf16.msra.mxu1 %v3216_v8  ;;  %2877 = vmatprep.mubr.msk.f32.mxu1 %vm3164_vm0, %v3165_v1 }
 0xfe7   :  { %3034 = vmatprep.subr.bf16.mxu1 %v3163_v0 }
 0xfe9   :  { %2878 = vmatmul.mubr.msk.f32.vlgmr.msra.gmra.mrb[20].mxu1 %vm77_vm1, %v1743_v38 }
 0xfea   :  { %3036 = vmatpush3.bf16.msra.mxu1 %v3277_v49  ;;  %2899 = vmatprep.mubr.msk.f32.mxu1 %vm3164_vm0, %v3165_v1 }
 0xfeb   :  { %3037 = vmatprep.subr.bf16.mxu1 %v3163_v0 }
 0xfee   :  { %3039 = vmatpush3.bf16.msra.mxu1 %v3292_v55 }
 0xfef   :  { %3043 = vmatprep.subr.bf16.mxu1 %v3163_v0 }
0x1045   :  { %v1628_v40 = vpop.f32.mrb[16].mxu1 }
0x1046   :  { %v1629_v41 = vadd.f32 %v3351_v27, %v1628_v40  ;;  %v2843_v42 = vpop.f32.mrb[17].mxu1 }
0x1048   :  { %3094 = vtanh.f32 %v1629_v41 }
0x1052   :  { %v3095_v43 = vpop.eup %3094 }
0x1053   :  { %1636 = vrot.lane.b32.xlu0 %v3095_v43, %s3166_s10  ;;  %v1633_v57 = vmul.f32 0.5, %v3095_v43 }
0x1055   :  { %v1634_v60 = vadd.f32 0.5, %v1633_v57 }
0x10b8   :  { %v1818_v44 = vpop.f32.mrb[18].mxu1 }
0x10b9   :  { %v1819_v45 = vadd.f32 %v3268_v36, %v1818_v44  ;;  %v2861_v46 = vpop.f32.mrb[19].mxu1 }
0x10bb   :  { %3096 = vtanh.f32 %v1819_v45 }
0x10bc   :  { %v2007_v48 = vpop.f32.mrb[20].mxu1 }
0x10bd   :  { %v2011_v50 = vadd.f32 %v2007_v48, %v199_v47  ;;  %v2879_v51 = vpop.f32.mrb[21].mxu1 }
0x10bf   :  { %3098 = vtanh.f32 %v2011_v50 }
0x10c5   :  { %v3097_v52 = vpop.eup %3096  ;;  %v1637_v53 = vpop.permute.xlu0 %1636 }
0x10c6   :  { %v1639_v54 = vsub.f32 %v3095_v43, %v1637_v53  ;;  %1826 = vrot.lane.b32.xlu1 %v3097_v52, %s3166_s10  ;;  %v1823_v2 = vmul.f32 0.5, %v3097_v52 }
0x10c8   :  { %1641 = vrot.lane.b32.xlu0 %v1639_v54, %s3166_s10  ;;  %v1824_v3 = vadd.f32 0.5, %v1823_v2 }
0x10c9   :  { %v3099_v56 = vpop.eup %3098 }
0x10ca   :  { %2016 = vrot.lane.b32.xlu1 %v3099_v56, %s3166_s10  ;;  %v2013_v4 = vmul.f32 0.5, %v3099_v56 }
0x10cc   :  { %v2014_v12 = vadd.f32 0.5, %v2013_v4 }
0x1138   :  { %v1827_v58 = vpop.permute.xlu1 %1826 }
0x1139   :  { %v1829_v59 = vsub.f32 %v3097_v52, %v1827_v58 }
0x113a   :  { %v1642_v18 = vpop.permute.xlu0 %1641 }
0x113b   :  { %v1644_v61 = vmul.f32 %v1642_v18, %v1634_v60  ;;  %1831 = vrot.lane.b32.xlu0 %v1829_v59, %s3166_s10 }
0x113c   :  { %v2017_v62 = vpop.permute.xlu1 %2016 }
0x113d   :  { %v2019_v63 = vsub.f32 %v3099_v56, %v2017_v62  ;;  %1646 = vrot.lane.b32.xlu1 %v1644_v61, %s3167_s11 }
0x113f   :  { %2021 = vrot.lane.b32.xlu0 %v2019_v63, %s3166_s10 }
0x11ad   :  { %v1832_v5 = vpop.permute.xlu0 %1831 }
0x11ae   :  { %v1834_v6 = vmul.f32 %v1832_v5, %v1824_v3 }
0x11af   :  { %v1647_v7 = vpop.permute.xlu1 %1646 }
0x11b0   :  { %v1649_v9 = vadd.f32 %v3095_v43, %v1647_v7  ;;  %1836 = vrot.lane.b32.xlu1 %v1834_v6, %s3167_s11 }
0x11b1   :  { %v2022_v13 = vpop.permute.xlu0 %2021 }
0x11b2   :  { %v2024_v15 = vmul.f32 %v2022_v13, %v2014_v12  ;;  %1841 = vrot.lane.b32.xlu0 %v1649_v9, %s3166_s10 }
0x11b4   :  { %2026 = vrot.lane.b32.xlu1 %v2024_v15, %s3167_s11 }
0x1222   :  { %v1837_v17 = vpop.permute.xlu1 %1836 }
0x1223   :  { %v1839_v19 = vadd.f32 %v3097_v52, %v1837_v17 }
0x1224   :  { %v1842_v20 = vpop.permute.xlu0 %1841 }
0x1225   :  { %v1844_v22 = vsel %vm77_vm1, %v1839_v19, %v1842_v20  ;;  %2031 = vrot.lane.b32.xlu0 %v1839_v19, %s3166_s10 }
0x1226   :  { %2871 = vmatmul.mubr.msk.f32.vlgmr.msra.gmra.mrb[22].mxu0 %vm318_vm2, %v1844_v22  ;;  %v2027_v23 = vpop.permute.xlu1 %2026 }
0x1227   :  { %3030 = vmatpush3.bf16.msra.mxu0 %v3238_v21  ;;  %2888 = vmatprep.mubr.msk.f32.mxu0 %vm3164_vm0, %v3165_v1  ;;  %v2029_v24 = vadd.f32 %v3099_v56, %v2027_v23 }
0x1228   :  { %3031 = vmatprep.subr.bf16.mxu0 %v3163_v0 }
0x122b   :  { %3033 = vmatpush3.bf16.msra.mxu0 %v3243_v26 }
0x122c   :  { %3040 = vmatprep.subr.bf16.mxu0 %v3163_v0 }
0x1297   :  { %v2032_v25 = vpop.permute.xlu0 %2031 }
0x1298   :  { %v2034_v28 = vsel %vm77_vm1, %v2029_v24, %v2032_v25 }
0x1299   :  { %2889 = vmatmul.mubr.msk.f32.vlgmr.msra.gmra.mrb[24].mxu0 %vm318_vm2, %v2034_v28 }
0x129a   :  { %3042 = vmatpush3.bf16.msra.mxu0 %v3216_v8  ;;  %2906 = vmatprep.mubr.msk.f32.mxu0 %vm3164_vm0, %v3165_v1 }
0x129b   :  { %3049 = vmatprep.subr.bf16.mxu0 %v3163_v0 }
0x129d   :  { %2907 = vmatmul.mubr.msk.f32.vlgmr.msra.gmra.mrb[26].mxu0 %vm77_vm1, %v2029_v24 }
0x129e   :  { %3051 = vmatpush3.bf16.msra.mxu0 %v3277_v49  ;;  %2928 = vmatprep.mubr.msk.f32.mxu0 %vm3164_vm0, %v3165_v1  ;;  %v204_v49 = vadd.f32 %v3322_v16, %v3234_v11 }
0x129f   :  { %3052 = vmatprep.subr.bf16.mxu0 %v3163_v0 }
0x12a2   :  { %3054 = vmatpush3.bf16.msra.mxu0 %v3292_v55 }
0x12f9   :  { %v1914_v29 = vpop.f32.mrb[22].mxu0 }
0x12fa   :  { %v1915_v14 = vadd.f32 %v3351_v27, %v1914_v29  ;;  %v2872_v8 = vpop.f32.mrb[23].mxu0 }
0x12fc   :  { %3100 = vtanh.f32 %v1915_v14 }
0x1306   :  { %v3101_v30 = vpop.eup %3100 }
0x1307   :  { %1922 = vrot.lane.b32.xlu1 %v3101_v30, %s3166_s10  ;;  %v1919_v40 = vmul.f32 0.5, %v3101_v30 }
0x1309   :  { %v1920_v43 = vadd.f32 0.5, %v1919_v40 }
0x136c   :  { %v2104_v31 = vpop.f32.mrb[24].mxu0 }
0x136d   :  { %v2105_v32 = vadd.f32 %v3268_v36, %v2104_v31  ;;  %v2890_v33 = vpop.f32.mrb[25].mxu0 }
0x136f   :  { %3102 = vtanh.f32 %v2105_v32 }
0x1370   :  { %v2293_v34 = vpop.f32.mrb[26].mxu0 }
0x1371   :  { %v2297_v35 = vadd.f32 %v2293_v34, %v204_v49  ;;  %v2908_v37 = vpop.f32.mrb[27].mxu0 }
0x1373   :  { %3104 = vtanh.f32 %v2297_v35 }
0x1379   :  { %v3103_v55 = vpop.eup %3102  ;;  %v1923_v38 = vpop.permute.xlu1 %1922 }
0x137a   :  { %v1925_v39 = vsub.f32 %v3101_v30, %v1923_v38  ;;  %2112 = vrot.lane.b32.xlu0 %v3103_v55, %s3166_s10  ;;  %v2109_v46 = vmul.f32 0.5, %v3103_v55 }
0x137c   :  { %1927 = vrot.lane.b32.xlu1 %v1925_v39, %s3166_s10  ;;  %v2110_v47 = vadd.f32 0.5, %v2109_v46 }
0x137d   :  { %v3105_v10 = vpop.eup %3104 }
0x137e   :  { %2302 = vrot.lane.b32.xlu0 %v3105_v10, %s3166_s10  ;;  %v2299_v48 = vmul.f32 0.5, %v3105_v10 }
0x1380   :  { %v2300_v54 = vadd.f32 0.5, %v2299_v48 }
0x13ec   :  { %v2113_v41 = vpop.permute.xlu0 %2112 }
0x13ed   :  { %v2115_v42 = vsub.f32 %v3103_v55, %v2113_v41 }
0x13ee   :  { %v1928_v11 = vpop.permute.xlu1 %1927 }
0x13ef   :  { %v1930_v16 = vmul.f32 %v1928_v11, %v1920_v43  ;;  %2117 = vrot.lane.b32.xlu1 %v2115_v42, %s3166_s10 }
0x13f0   :  { %v2303_v44 = vpop.permute.xlu0 %2302 }
0x13f1   :  { %v2305_v45 = vsub.f32 %v3105_v10, %v2303_v44  ;;  %1932 = vrot.lane.b32.xlu0 %v1930_v16, %s3167_s11 }
0x13f3   :  { %2307 = vrot.lane.b32.xlu1 %v2305_v45, %s3166_s10 }
0x1461   :  { %v2118_v50 = vpop.permute.xlu1 %2117 }
0x1462   :  { %v2120_v51 = vmul.f32 %v2118_v50, %v2110_v47 }
0x1463   :  { %v1933_v52 = vpop.permute.xlu0 %1932 }
0x1464   :  { %v1935_v53 = vadd.f32 %v3101_v30, %v1933_v52  ;;  %2122 = vrot.lane.b32.xlu0 %v2120_v51, %s3167_s11 }
0x1465   :  { %v2308_v56 = vpop.permute.xlu1 %2307 }
0x1466   :  { %v2310_v57 = vmul.f32 %v2308_v56, %v2300_v54  ;;  %2127 = vrot.lane.b32.xlu1 %v1935_v53, %s3166_s10 }
0x1468   :  { %2312 = vrot.lane.b32.xlu0 %v2310_v57, %s3167_s11 }
0x14d6   :  { %v2123_v58 = vpop.permute.xlu0 %2122 }
0x14d7   :  { %v2125_v59 = vadd.f32 %v3103_v55, %v2123_v58 }
0x14d8   :  { %v2128_v60 = vpop.permute.xlu1 %2127 }
0x14d9   :  { %v2130_v18 = vsel %vm77_vm1, %v2125_v59, %v2128_v60  ;;  %2317 = vrot.lane.b32.xlu1 %v2125_v59, %s3166_s10 }
0x14da   :  { %v2313_v61 = vpop.permute.xlu0 %2312  ;;  %2900 = vmatmul.mubr.msk.f32.vlgmr.msra.gmra.mrb[22].mxu1 %vm318_vm2, %v2130_v18 }
0x14db   :  { %v2315_v62 = vadd.f32 %v3105_v10, %v2313_v61  ;;  %3045 = vmatpush3.bf16.msra.mxu1 %v3238_v21  ;;  %2917 = vmatprep.mubr.msk.f32.mxu1 %vm3164_vm0, %v3165_v1 }
0x14dc   :  { %3046 = vmatprep.subr.bf16.mxu1 %v3163_v0 }
0x14dd   :  { %2508 = vst.msk [vmem:[#allocation6] sm:$0xff] %vm77_vm1, %v2315_v62 }
0x14df   :  { %3048 = vmatpush3.bf16.msra.mxu1 %v3243_v26 }
0x154b   :  { %v2318_v63 = vpop.permute.xlu1 %2317 }
0x154c   :  { %v2320_v2 = vsel %vm77_vm1, %v2315_v62, %v2318_v63 }
0x154d   :  { %2918 = vmatmul.mubr.msk.f32.vlgmr.msra.gmra.mrb[24].mxu1 %vm318_vm2, %v2320_v2 }
0x15ad   :  { %v2200_v3 = vpop.f32.mrb[22].mxu1 }
0x15ae   :  { %v2201_v4 = vadd.f32 %v3351_v27, %v2200_v3  ;;  %v2901_v5 = vpop.f32.mrb[23].mxu1 }
0x15b0   :  { %3106 = vtanh.f32 %v2201_v4 }
0x15ba   :  { %v3107_v21 = vpop.eup %3106 }
0x15bb   :  { %2208 = vrot.lane.b32.xlu0 %v3107_v21, %s3166_s10  ;;  %v2205_v12 = vmul.f32 0.5, %v3107_v21 }
0x15bd   :  { %v2206_v17 = vadd.f32 0.5, %v2205_v12 }
0x1620   :  { %v2390_v1 = vpop.f32.mrb[24].mxu1 }
0x1621   :  { %v2391_v0 = vadd.f32 %v3268_v36, %v2390_v1  ;;  %v2919_v6 = vpop.f32.mrb[25].mxu1 }
0x1623   :  { %3108 = vtanh.f32 %v2391_v0 }
0x162d   :  { %v3109_v7 = vpop.eup %3108  ;;  %v2209_v26 = vpop.permute.xlu0 %2208 }
0x162e   :  { %v2211_v9 = vsub.f32 %v3107_v21, %v2209_v26  ;;  %2398 = vrot.lane.b32.xlu1 %v3109_v7, %s3166_s10  ;;  %v2395_v36 = vmul.f32 0.5, %v3109_v7 }
0x1630   :  { %2213 = vrot.lane.b32.xlu0 %v2211_v9, %s3166_s10  ;;  %v2396_v22 = vadd.f32 0.5, %v2395_v36 }
0x16a0   :  { %v2399_v13 = vpop.permute.xlu1 %2398 }
0x16a1   :  { %v2401_v15 = vsub.f32 %v3109_v7, %v2399_v13 }
0x16a2   :  { %v2214_v19 = vpop.permute.xlu0 %2213 }
0x16a3   :  { %v2216_v20 = vmul.f32 %v2214_v19, %v2206_v17  ;;  %2403 = vrot.lane.b32.xlu1 %v2401_v15, %s3166_s10 }
0x16a5   :  { %2218 = vrot.lane.b32.xlu0 %v2216_v20, %s3167_s11 }
0x1715   :  { %v2404_v23 = vpop.permute.xlu1 %2403 }
0x1716   :  { %v2406_v24 = vmul.f32 %v2404_v23, %v2396_v22 }
0x1717   :  { %v2219_v25 = vpop.permute.xlu0 %2218 }
0x1718   :  { %v2221_v28 = vadd.f32 %v3107_v21, %v2219_v25  ;;  %2408 = vrot.lane.b32.xlu1 %v2406_v24, %s3167_s11 }
0x171a   :  { %2413 = vrot.lane.b32.xlu0 %v2221_v28, %s3166_s10 }
0x178a   :  { %v2409_v29 = vpop.permute.xlu1 %2408 }
0x178b   :  { %v2411_v14 = vadd.f32 %v3109_v7, %v2409_v29 }
0x178c   :  { %v2414_v8 = vpop.permute.xlu0 %2413 }
0x178d   :  { %2510 = vst.msk [vmem:[#allocation6 + $0x8] sm:$0xff] %vm77_vm1, %v2411_v14  ;;  %v2416_v30 = vsel %vm77_vm1, %v2411_v14, %v2414_v8 }
0x178e   :  { %2929 = vmatmul.mubr.msk.f32.vlgmr.msra.gmra.mrb[28].mxu0 %vm318_vm2, %v2416_v30 }
0x1861   :  { %v2486_v31 = vpop.f32.mrb[28].mxu0 }
0x1862   :  { %v2487_v32 = vadd.f32 %v3351_v27, %v2486_v31  ;;  %v2930_v33 = vpop.f32.mrb[29].mxu0 }
0x1864   :  { %3110 = vtanh.f32 %v2487_v32 }
0x186e   :  { %v3111_v49 = vpop.eup %3110 }
0x186f   :  { %2494 = vrot.lane.b32.xlu1 %v3111_v49, %s3166_s10  ;;  %v2491_v37 = vmul.f32 0.5, %v3111_v49 }
0x1871   :  { %v2492_v55 = vadd.f32 0.5, %v2491_v37 }
0x18e1   :  { %v2495_v34 = vpop.permute.xlu1 %2494 }
0x18e2   :  { %v2497_v35 = vsub.f32 %v3111_v49, %v2495_v34 }
0x18e4   :  { %2499 = vrot.lane.b32.xlu0 %v2497_v35, %s3166_s10 }
0x1956   :  { %v2500_v38 = vpop.permute.xlu0 %2499 }
0x1957   :  { %v2502_v39 = vmul.f32 %v2500_v38, %v2492_v55 }
0x1959   :  { %2504 = vrot.lane.b32.xlu1 %v2502_v39, %s3167_s11 }
0x19cb   :  { %v2505_v10 = vpop.permute.xlu1 %2504 }
0x19cc   :  { %v2507_v40 = vadd.f32 %v3111_v49, %v2505_v10 }
0x19ce   :  { %2512 = vst.msk [vmem:[#allocation6 + $0x10] sm:$0xff] %vm77_vm1, %v2507_v40 }
0x19cf   :  { %3145 = shalt.err (!%p3142_p12)
}
0x19d0   :  { %s3146_s9 = scalar_lea.hbm %s3592_s4, 384 }
0x19d1   :  { %p3147_p13 = scmp.ne.s32.totalorder %s3592_s4, %s3146_s9  ;;  %p3150_p0 = scmp.lt.u32.totalorder %s3146_s9, %s3592_s4 }
0x19d3   :  { %p3152_p1 = pnand %p3150_p0, %p3147_p13 }
0x19d5   :  { %3155 = shalt.err (!%p3152_p1)
}
0x19d6   :  { %2524 = dma.vmem_to_hbm [thread:$0]  %s2519_s5, 384, %s3592_s4, [#allocation5], %s3161_s25, %s3161_s25, %s3162_s26  }
0x19d7   :  { %3158 = dma.done.wait [#allocation5], 384  }
0x19d8   :  { %3159 = vsyncadd [#allocation5], 4294966912 }
0x19d9   :  { %2528 = vsyncpa [#allocation4], 1 }
0x19da   :  { %2529 = vsyncpa [#allocation5], 1 }

</bundles_post_ra>
